<compile_context>
chip_gen: v6e
topology: v6e:2x2x1
jax: 0.10.0
libtpu: 0.0.40
codegen_flags: <defaults>
</compile_context>

<pallas_src>
import numpy as np
import jax
import jax.numpy as jnp
from jax.experimental import pallas as pl
from jax.experimental.pallas import tpu as pltpu

E = float(np.e)


def _make_emma_kernel(M):
    def emma_kernel(scal_ref, vmin_ref, w_ref, bc_ref, wc_ref, gam_ref, *refs):
        x_refs = refs[:M]
        xp_refs = refs[M:2 * M]
        logs_ref = refs[2 * M]

        gain = scal_ref[0]
        bias_att = scal_ref[1]
        tau = scal_ref[2]

        TN, D = x_refs[0].shape
        inv_d = 1.0 / D

        # --- potentials + correction, per mode, column layout (TN, 1) -------
        # TODO(synk): autoencoders[i].potential(x[i]) is an external module; a
        # deterministic surrogate (per-sample mean squared activation) is used.
        v_cols, lv_cols = [], []
        for i in range(M):
            xi = x_refs[i][...].astype(jnp.float32)                   # (TN, D)
            pot = jnp.sum(xi * xi, axis=-1, keepdims=True) * inv_d    # (TN, 1)
            vi = jnp.maximum(pot - vmin_ref[i] + E, E)                # clamp at e
            vi = vi * w_ref[i] + bc_ref[i]
            v_cols.append(vi)
            lv_cols.append(jnp.log(vi))       # reused by every coupling term

        # --- modal energies: diagonal + cross-mode coupling -----------------
        z_cols = []
        for i in range(M):
            acc = v_cols[i]
            for j in range(M):
                if j == i:
                    continue
                g = gam_ref[i, j]
                acc = acc + wc_ref[i, j] * jnp.exp(
                    g * lv_cols[i] + (1.0 - g) * lv_cols[j])
            z_cols.append((-tau) * acc)                               # (TN, 1)

        # --- stable log-softmax over modes -----------------------------------
        zmax = z_cols[0]
        for i in range(1, M):
            zmax = jnp.maximum(zmax, z_cols[i])
        sumexp = jnp.exp(z_cols[0] - zmax)
        for i in range(1, M):
            sumexp = sumexp + jnp.exp(z_cols[i] - zmax)
        lse = jnp.log(sumexp) + zmax                                  # (TN, 1)

        logs_cols = [z_cols[i] - lse for i in range(M)]

        # Assemble the (TN, M) logs block with broadcasts + selects (no
        # concat/relayout needed; M is tiny).
        col_ids = jax.lax.broadcasted_iota(jnp.int32, (TN, M), 1)
        logs_block = jnp.zeros((TN, M), jnp.float32)
        for i in range(M):
            logs_block = jnp.where(col_ids == i, logs_cols[i], logs_block)
        logs_ref[...] = logs_block

        # --- alphas -> betas -> attention-scaled outputs ----------------------
        for i in range(M):
            alpha = jnp.exp(logs_cols[i])                             # (TN, 1)
            beta = jnp.maximum(jnp.tanh(gain * alpha - bias_att), 0.0)
            xi = x_refs[i][...].astype(jnp.float32)   # re-read: low vreg pressure
            xp_refs[i][...] = (beta * xi).astype(xp_refs[i].dtype)

    return emma_kernel


def _choose_tile_n(M, N, D, itemsize, budget_bytes=40 << 20, max_tile=2048):
    """Largest N-tile dividing N whose double-buffered x + xprime tiles fit
    the VMEM budget, preferring an even grid with >= 4 steps (2 v7x
    TensorCores x >= 2 pipelined steps each)."""
    step = 8 * max(1, 4 // max(1, itemsize))      # 8 for f32, 16 for bf16 tiles
    if N <= step:
        return N

    def fits(tn):
        per_sample = 2 * M * D * (2 * itemsize) + 2 * M * 4  # 2 bufs x (x+xp)+logs
        return tn * per_sample <= budget_bytes

    cands = [tn for tn in range(step, min(max_tile, N) + 1, step)
             if N % tn == 0 and fits(tn)]
    if not cands:
        return N                                  # block == full dim (always legal)
    best4 = [tn for tn in cands if (N // tn) % 2 == 0 and (N // tn) >= 4]
    if best4:
        return max(best4)
    even = [tn for tn in cands if (N // tn) % 2 == 0]
    if even:
        return max(even)
    return max(cands)


def emma_forward(x_list, vmin, w, bias_correction, W_coupling, gammas,
                 gain, bias_attention, tau, tile_n=None, io_dtype=jnp.bfloat16):
    """EMMA forward: returns ([xprime_i], logs) with logs of shape (N, M)."""
    M = len(x_list)
    x_list = [jnp.asarray(xi, io_dtype) for xi in x_list]
    N, D = x_list[0].shape
    itemsize = jnp.dtype(io_dtype).itemsize
    if tile_n is None:
        tile_n = _choose_tile_n(M, N, D, itemsize)
    assert N % tile_n == 0, "tile_n must divide N"
    grid_n = N // tile_n

    # Explicit scoped-VMEM limit: double-buffered tiles + headroom. The v5e
    # default (16 MiB) and v7x default (32 MiB) otherwise gate the compile.
    tile_bytes = 2 * (2 * M * tile_n * D * itemsize + tile_n * M * 4)
    vmem_limit = int(max(tile_bytes + (8 << 20), 32 << 20))

    scal = jnp.array([gain, bias_attention, tau], dtype=jnp.float32)
    smem = pl.BlockSpec(memory_space=pltpu.MemorySpace.SMEM)
    x_spec = pl.BlockSpec((tile_n, D), lambda n: (n, 0))
    logs_spec = pl.BlockSpec((tile_n, M), lambda n: (n, 0))

    # TODO(synk): if the caller does not need x afterwards, input_output_aliases
    # could alias each x input to its xprime output (saves M*N*D HBM footprint).
    outs = pl.pallas_call(
        _make_emma_kernel(M),
        out_shape=tuple(
            [jax.ShapeDtypeStruct((N, D), io_dtype) for _ in range(M)]
            + [jax.ShapeDtypeStruct((N, M), jnp.float32)]),
        grid=(grid_n,),
        in_specs=[smem] * 6 + [x_spec] * M,
        out_specs=tuple([x_spec] * M + [logs_spec]),
        compiler_params=pltpu.CompilerParams(
            dimension_semantics=("parallel",),
            vmem_limit_bytes=vmem_limit),
    )(scal,
      jnp.asarray(vmin, jnp.float32).reshape(M),
      jnp.asarray(w, jnp.float32).reshape(M),
      jnp.asarray(bias_correction, jnp.float32).reshape(M),
      jnp.asarray(W_coupling, jnp.float32),
      jnp.asarray(gammas, jnp.float32),
      *x_list)

    xprime = list(outs[:M])
    logs = outs[M]
    return xprime, logs


def emma_reference(x_list, vmin, w, bc, Wc, gammas, gain, batt, tau):
    """Pure-JAX mirror of the PyTorch forward (same surrogate potential)."""
    x = jnp.stack([jnp.asarray(xi, jnp.float32) for xi in x_list])   # (M, N, D)
    M = x.shape[0]
    pot = jnp.mean(x * x, axis=-1).T                                 # (N, M)
    v = pot - vmin[None, :] + E
    v = jnp.maximum(v, E)
    v = v * w[None, :] + bc[None, :]
    N = v.shape[0]
    pe = jnp.zeros((N, M, M), jnp.float32)
    for i in range(M):
        for j in range(M):
            if i == j:
                pe = pe.at[:, i, j].set(v[:, i])
            else:
                g = gammas[i, j]
                pe = pe.at[:, i, j].set(
                    Wc[i, j] * v[:, i] ** g * v[:, j] ** (1.0 - g))
    modal = pe.sum(-1)
    logs = jax.nn.log_softmax(-tau * modal, axis=-1)
    alphas = jnp.exp(logs)
    betas = jnp.maximum(jnp.tanh(gain * alphas - batt), 0.0)
    xprime = betas.T[:, :, None] * x
    return xprime, logs


if __name__ == "__main__":
    key = jax.random.PRNGKey(0)
    M, N, D = 3, 256, 128                       # n_modes, batch, features
    k_x, k_wc, k_vmin = jax.random.split(key, 3)
    x_list_f32 = [jax.random.normal(jax.random.fold_in(k_x, i), (N, D), jnp.float32)
                  for i in range(M)]

    # deterministic parameter init (mirrors EMMA.__init__)
    w = jnp.ones((M,), jnp.float32)
    W_coupling = jax.random.uniform(k_wc, (M, M), jnp.float32,
                                    minval=-1.0 / (M - 1), maxval=1.0 / (M - 1))
    bias_correction = jnp.zeros((M,), jnp.float32)
    gammas = 0.5 * jnp.ones((M, M), jnp.float32)
    gain = 1.0
    bias_attention = 0.0
    tau = 1.0
    vmin = 0.1 * jax.random.uniform(k_vmin, (M,), jnp.float32)

    # Chooser picks tile_n=64 -> grid of 4 steps (even, >= 2 per TensorCore).
    xprime, logs = emma_forward(x_list_f32, vmin, w, bias_correction, W_coupling,
                                gammas, gain, bias_attention, tau)
    jax.block_until_ready((xprime, logs))

    # Reference is fed the same bf16-rounded inputs the kernel sees; kernel
    # compute is f32 so logs stay tight, xprime differs only by bf16 rounding.
    x_list_bf16 = [xi.astype(jnp.bfloat16) for xi in x_list_f32]
    xp_ref, logs_expected = emma_reference(x_list_bf16, vmin, w, bias_correction,
                                           W_coupling, gammas, gain,
                                           bias_attention, tau)

    xp = jnp.stack([xi.astype(jnp.float32) for xi in xprime])
    assert xp.shape == (M, N, D) and logs.shape == (N, M)
    assert bool(jnp.allclose(logs, logs_expected, rtol=2e-3, atol=1e-3)), "logs mismatch"
    assert bool(jnp.allclose(xp, xp_ref, rtol=1e-2, atol=5e-3)), "xprime mismatch"
    print("KERNEL_OK")
</pallas_src>

<mosaic_0001>
module attributes {stable_mosaic.version = 11 : i64} {
  func.func @emma_kernel(%arg0: i32, %arg1: memref<3xf32, #tpu.memory_space<smem>>, %arg2: memref<3xf32, #tpu.memory_space<smem>>, %arg3: memref<3xf32, #tpu.memory_space<smem>>, %arg4: memref<3xf32, #tpu.memory_space<smem>>, %arg5: memref<3x3xf32, #tpu.memory_space<smem>>, %arg6: memref<3x3xf32, #tpu.memory_space<smem>>, %arg7: memref<64x128xbf16, #tpu.memory_space<vmem>>, %arg8: memref<64x128xbf16, #tpu.memory_space<vmem>>, %arg9: memref<64x128xbf16, #tpu.memory_space<vmem>>, %arg10: memref<64x128xbf16, #tpu.memory_space<vmem>>, %arg11: memref<64x128xbf16, #tpu.memory_space<vmem>>, %arg12: memref<64x128xbf16, #tpu.memory_space<vmem>>, %arg13: memref<64x3xf32, #tpu.memory_space<vmem>>) attributes {dimension_semantics = [#tpu.dimension_semantics<parallel>], iteration_bounds = array<i64: 4>, scalar_prefetch = 0 : i64, scratch_operands = 0 : i64, tpu.core_type = #tpu.core_type<tc>, window_params = [{transform_indices = @transform_0, window_bounds = array<i64: 3>}, {transform_indices = @transform_1, window_bounds = array<i64: 3>}, {transform_indices = @transform_2, window_bounds = array<i64: 3>}, {transform_indices = @transform_3, window_bounds = array<i64: 3>}, {transform_indices = @transform_4, window_bounds = array<i64: 3, 3>}, {transform_indices = @transform_5, window_bounds = array<i64: 3, 3>}, {transform_indices = @transform_6, window_bounds = array<i64: 64, 128>}, {transform_indices = @transform_7, window_bounds = array<i64: 64, 128>}, {transform_indices = @transform_8, window_bounds = array<i64: 64, 128>}, {transform_indices = @transform_9, window_bounds = array<i64: 64, 128>}, {transform_indices = @transform_10, window_bounds = array<i64: 64, 128>}, {transform_indices = @transform_11, window_bounds = array<i64: 64, 128>}, {transform_indices = @transform_12, window_bounds = array<i64: 64, 3>}]} {
    %c0 = arith.constant 0 : index
    %0 = memref.load %arg1[%c0] : memref<3xf32, #tpu.memory_space<smem>>
    %c1 = arith.constant 1 : index
    %1 = memref.load %arg1[%c1] : memref<3xf32, #tpu.memory_space<smem>>
    %c2 = arith.constant 2 : index
    %2 = memref.load %arg1[%c2] : memref<3xf32, #tpu.memory_space<smem>>
    %c0_0 = arith.constant 0 : index
    %c0_1 = arith.constant 0 : index
    %3 = vector.load %arg7[%c0_0, %c0_1] : memref<64x128xbf16, #tpu.memory_space<vmem>>, vector<64x128xbf16>
    %4 = arith.extf %3 : vector<64x128xbf16> to vector<64x128xf32>
    %5 = arith.mulf %4, %4 : vector<64x128xf32>
    %cst = arith.constant dense<0.000000e+00> : vector<64xf32>
    %6 = vector.multi_reduction <add>, %5, %cst [1] : vector<64x128xf32> to vector<64xf32>
    %7 = vector.shape_cast %6 : vector<64xf32> to vector<64x1xf32>
    %cst_2 = arith.constant 7.812500e-03 : f32
    %8 = vector.broadcast %cst_2 : f32 to vector<64x1xf32>
    %9 = arith.mulf %7, %8 : vector<64x1xf32>
    %c0_3 = arith.constant 0 : index
    %10 = memref.load %arg2[%c0_3] : memref<3xf32, #tpu.memory_space<smem>>
    %11 = vector.broadcast %10 : f32 to vector<64x1xf32>
    %12 = arith.subf %9, %11 : vector<64x1xf32>
    %cst_4 = arith.constant 2.71828175 : f32
    %13 = vector.broadcast %cst_4 : f32 to vector<64x1xf32>
    %14 = arith.addf %12, %13 : vector<64x1xf32>
    %cst_5 = arith.constant 2.71828175 : f32
    %15 = vector.broadcast %cst_5 : f32 to vector<64x1xf32>
    %16 = arith.maximumf %14, %15 : vector<64x1xf32>
    %c0_6 = arith.constant 0 : index
    %17 = memref.load %arg3[%c0_6] : memref<3xf32, #tpu.memory_space<smem>>
    %18 = vector.broadcast %17 : f32 to vector<64x1xf32>
    %19 = arith.mulf %16, %18 : vector<64x1xf32>
    %c0_7 = arith.constant 0 : index
    %20 = memref.load %arg4[%c0_7] : memref<3xf32, #tpu.memory_space<smem>>
    %21 = vector.broadcast %20 : f32 to vector<64x1xf32>
    %22 = arith.addf %19, %21 : vector<64x1xf32>
    %23 = math.log %22 : vector<64x1xf32>
    %c0_8 = arith.constant 0 : index
    %c0_9 = arith.constant 0 : index
    %24 = vector.load %arg8[%c0_8, %c0_9] : memref<64x128xbf16, #tpu.memory_space<vmem>>, vector<64x128xbf16>
    %25 = arith.extf %24 : vector<64x128xbf16> to vector<64x128xf32>
    %26 = arith.mulf %25, %25 : vector<64x128xf32>
    %cst_10 = arith.constant dense<0.000000e+00> : vector<64xf32>
    %27 = vector.multi_reduction <add>, %26, %cst_10 [1] : vector<64x128xf32> to vector<64xf32>
    %28 = vector.shape_cast %27 : vector<64xf32> to vector<64x1xf32>
    %cst_11 = arith.constant 7.812500e-03 : f32
    %29 = vector.broadcast %cst_11 : f32 to vector<64x1xf32>
    %30 = arith.mulf %28, %29 : vector<64x1xf32>
    %c1_12 = arith.constant 1 : index
    %31 = memref.load %arg2[%c1_12] : memref<3xf32, #tpu.memory_space<smem>>
    %32 = vector.broadcast %31 : f32 to vector<64x1xf32>
    %33 = arith.subf %30, %32 : vector<64x1xf32>
    %cst_13 = arith.constant 2.71828175 : f32
    %34 = vector.broadcast %cst_13 : f32 to vector<64x1xf32>
    %35 = arith.addf %33, %34 : vector<64x1xf32>
    %cst_14 = arith.constant 2.71828175 : f32
    %36 = vector.broadcast %cst_14 : f32 to vector<64x1xf32>
    %37 = arith.maximumf %35, %36 : vector<64x1xf32>
    %c1_15 = arith.constant 1 : index
    %38 = memref.load %arg3[%c1_15] : memref<3xf32, #tpu.memory_space<smem>>
    %39 = vector.broadcast %38 : f32 to vector<64x1xf32>
    %40 = arith.mulf %37, %39 : vector<64x1xf32>
    %c1_16 = arith.constant 1 : index
    %41 = memref.load %arg4[%c1_16] : memref<3xf32, #tpu.memory_space<smem>>
    %42 = vector.broadcast %41 : f32 to vector<64x1xf32>
    %43 = arith.addf %40, %42 : vector<64x1xf32>
    %44 = math.log %43 : vector<64x1xf32>
    %c0_17 = arith.constant 0 : index
    %c0_18 = arith.constant 0 : index
    %45 = vector.load %arg9[%c0_17, %c0_18] : memref<64x128xbf16, #tpu.memory_space<vmem>>, vector<64x128xbf16>
    %46 = arith.extf %45 : vector<64x128xbf16> to vector<64x128xf32>
    %47 = arith.mulf %46, %46 : vector<64x128xf32>
    %cst_19 = arith.constant dense<0.000000e+00> : vector<64xf32>
    %48 = vector.multi_reduction <add>, %47, %cst_19 [1] : vector<64x128xf32> to vector<64xf32>
    %49 = vector.shape_cast %48 : vector<64xf32> to vector<64x1xf32>
    %cst_20 = arith.constant 7.812500e-03 : f32
    %50 = vector.broadcast %cst_20 : f32 to vector<64x1xf32>
    %51 = arith.mulf %49, %50 : vector<64x1xf32>
    %c2_21 = arith.constant 2 : index
    %52 = memref.load %arg2[%c2_21] : memref<3xf32, #tpu.memory_space<smem>>
    %53 = vector.broadcast %52 : f32 to vector<64x1xf32>
    %54 = arith.subf %51, %53 : vector<64x1xf32>
    %cst_22 = arith.constant 2.71828175 : f32
    %55 = vector.broadcast %cst_22 : f32 to vector<64x1xf32>
    %56 = arith.addf %54, %55 : vector<64x1xf32>
    %cst_23 = arith.constant 2.71828175 : f32
    %57 = vector.broadcast %cst_23 : f32 to vector<64x1xf32>
    %58 = arith.maximumf %56, %57 : vector<64x1xf32>
    %c2_24 = arith.constant 2 : index
    %59 = memref.load %arg3[%c2_24] : memref<3xf32, #tpu.memory_space<smem>>
    %60 = vector.broadcast %59 : f32 to vector<64x1xf32>
    %61 = arith.mulf %58, %60 : vector<64x1xf32>
    %c2_25 = arith.constant 2 : index
    %62 = memref.load %arg4[%c2_25] : memref<3xf32, #tpu.memory_space<smem>>
    %63 = vector.broadcast %62 : f32 to vector<64x1xf32>
    %64 = arith.addf %61, %63 : vector<64x1xf32>
    %65 = math.log %64 : vector<64x1xf32>
    %c0_26 = arith.constant 0 : index
    %c1_27 = arith.constant 1 : index
    %66 = memref.load %arg6[%c0_26, %c1_27] : memref<3x3xf32, #tpu.memory_space<smem>>
    %c0_28 = arith.constant 0 : index
    %c1_29 = arith.constant 1 : index
    %67 = memref.load %arg5[%c0_28, %c1_29] : memref<3x3xf32, #tpu.memory_space<smem>>
    %68 = vector.broadcast %66 : f32 to vector<64x1xf32>
    %69 = arith.mulf %68, %23 : vector<64x1xf32>
    %cst_30 = arith.constant 1.000000e+00 : f32
    %70 = arith.subf %cst_30, %66 : f32
    %71 = vector.broadcast %70 : f32 to vector<64x1xf32>
    %72 = arith.mulf %71, %44 : vector<64x1xf32>
    %73 = arith.addf %69, %72 : vector<64x1xf32>
    %74 = math.exp %73 : vector<64x1xf32>
    %75 = vector.broadcast %67 : f32 to vector<64x1xf32>
    %76 = arith.mulf %75, %74 : vector<64x1xf32>
    %77 = arith.addf %22, %76 : vector<64x1xf32>
    %c0_31 = arith.constant 0 : index
    %c2_32 = arith.constant 2 : index
    %78 = memref.load %arg6[%c0_31, %c2_32] : memref<3x3xf32, #tpu.memory_space<smem>>
    %c0_33 = arith.constant 0 : index
    %c2_34 = arith.constant 2 : index
    %79 = memref.load %arg5[%c0_33, %c2_34] : memref<3x3xf32, #tpu.memory_space<smem>>
    %80 = vector.broadcast %78 : f32 to vector<64x1xf32>
    %81 = arith.mulf %80, %23 : vector<64x1xf32>
    %cst_35 = arith.constant 1.000000e+00 : f32
    %82 = arith.subf %cst_35, %78 : f32
    %83 = vector.broadcast %82 : f32 to vector<64x1xf32>
    %84 = arith.mulf %83, %65 : vector<64x1xf32>
    %85 = arith.addf %81, %84 : vector<64x1xf32>
    %86 = math.exp %85 : vector<64x1xf32>
    %87 = vector.broadcast %79 : f32 to vector<64x1xf32>
    %88 = arith.mulf %87, %86 : vector<64x1xf32>
    %89 = arith.addf %77, %88 : vector<64x1xf32>
    %cst_36 = arith.constant 0.000000e+00 : f32
    %90 = arith.subf %cst_36, %2 : f32
    %91 = vector.broadcast %90 : f32 to vector<64x1xf32>
    %92 = arith.mulf %91, %89 : vector<64x1xf32>
    %c1_37 = arith.constant 1 : index
    %c0_38 = arith.constant 0 : index
    %93 = memref.load %arg6[%c1_37, %c0_38] : memref<3x3xf32, #tpu.memory_space<smem>>
    %c1_39 = arith.constant 1 : index
    %c0_40 = arith.constant 0 : index
    %94 = memref.load %arg5[%c1_39, %c0_40] : memref<3x3xf32, #tpu.memory_space<smem>>
    %95 = vector.broadcast %93 : f32 to vector<64x1xf32>
    %96 = arith.mulf %95, %44 : vector<64x1xf32>
    %cst_41 = arith.constant 1.000000e+00 : f32
    %97 = arith.subf %cst_41, %93 : f32
    %98 = vector.broadcast %97 : f32 to vector<64x1xf32>
    %99 = arith.mulf %98, %23 : vector<64x1xf32>
    %100 = arith.addf %96, %99 : vector<64x1xf32>
    %101 = math.exp %100 : vector<64x1xf32>
    %102 = vector.broadcast %94 : f32 to vector<64x1xf32>
    %103 = arith.mulf %102, %101 : vector<64x1xf32>
    %104 = arith.addf %43, %103 : vector<64x1xf32>
    %c1_42 = arith.constant 1 : index
    %c2_43 = arith.constant 2 : index
    %105 = memref.load %arg6[%c1_42, %c2_43] : memref<3x3xf32, #tpu.memory_space<smem>>
    %c1_44 = arith.constant 1 : index
    %c2_45 = arith.constant 2 : index
    %106 = memref.load %arg5[%c1_44, %c2_45] : memref<3x3xf32, #tpu.memory_space<smem>>
    %107 = vector.broadcast %105 : f32 to vector<64x1xf32>
    %108 = arith.mulf %107, %44 : vector<64x1xf32>
    %cst_46 = arith.constant 1.000000e+00 : f32
    %109 = arith.subf %cst_46, %105 : f32
    %110 = vector.broadcast %109 : f32 to vector<64x1xf32>
    %111 = arith.mulf %110, %65 : vector<64x1xf32>
    %112 = arith.addf %108, %111 : vector<64x1xf32>
    %113 = math.exp %112 : vector<64x1xf32>
    %114 = vector.broadcast %106 : f32 to vector<64x1xf32>
    %115 = arith.mulf %114, %113 : vector<64x1xf32>
    %116 = arith.addf %104, %115 : vector<64x1xf32>
    %cst_47 = arith.constant 0.000000e+00 : f32
    %117 = arith.subf %cst_47, %2 : f32
    %118 = vector.broadcast %117 : f32 to vector<64x1xf32>
    %119 = arith.mulf %118, %116 : vector<64x1xf32>
    %c2_48 = arith.constant 2 : index
    %c0_49 = arith.constant 0 : index
    %120 = memref.load %arg6[%c2_48, %c0_49] : memref<3x3xf32, #tpu.memory_space<smem>>
    %c2_50 = arith.constant 2 : index
    %c0_51 = arith.constant 0 : index
    %121 = memref.load %arg5[%c2_50, %c0_51] : memref<3x3xf32, #tpu.memory_space<smem>>
    %122 = vector.broadcast %120 : f32 to vector<64x1xf32>
    %123 = arith.mulf %122, %65 : vector<64x1xf32>
    %cst_52 = arith.constant 1.000000e+00 : f32
    %124 = arith.subf %cst_52, %120 : f32
    %125 = vector.broadcast %124 : f32 to vector<64x1xf32>
    %126 = arith.mulf %125, %23 : vector<64x1xf32>
    %127 = arith.addf %123, %126 : vector<64x1xf32>
    %128 = math.exp %127 : vector<64x1xf32>
    %129 = vector.broadcast %121 : f32 to vector<64x1xf32>
    %130 = arith.mulf %129, %128 : vector<64x1xf32>
    %131 = arith.addf %64, %130 : vector<64x1xf32>
    %c2_53 = arith.constant 2 : index
    %c1_54 = arith.constant 1 : index
    %132 = memref.load %arg6[%c2_53, %c1_54] : memref<3x3xf32, #tpu.memory_space<smem>>
    %c2_55 = arith.constant 2 : index
    %c1_56 = arith.constant 1 : index
    %133 = memref.load %arg5[%c2_55, %c1_56] : memref<3x3xf32, #tpu.memory_space<smem>>
    %134 = vector.broadcast %132 : f32 to vector<64x1xf32>
    %135 = arith.mulf %134, %65 : vector<64x1xf32>
    %cst_57 = arith.constant 1.000000e+00 : f32
    %136 = arith.subf %cst_57, %132 : f32
    %137 = vector.broadcast %136 : f32 to vector<64x1xf32>
    %138 = arith.mulf %137, %44 : vector<64x1xf32>
    %139 = arith.addf %135, %138 : vector<64x1xf32>
    %140 = math.exp %139 : vector<64x1xf32>
    %141 = vector.broadcast %133 : f32 to vector<64x1xf32>
    %142 = arith.mulf %141, %140 : vector<64x1xf32>
    %143 = arith.addf %131, %142 : vector<64x1xf32>
    %cst_58 = arith.constant 0.000000e+00 : f32
    %144 = arith.subf %cst_58, %2 : f32
    %145 = vector.broadcast %144 : f32 to vector<64x1xf32>
    %146 = arith.mulf %145, %143 : vector<64x1xf32>
    %147 = arith.maximumf %92, %119 : vector<64x1xf32>
    %148 = arith.maximumf %147, %146 : vector<64x1xf32>
    %149 = arith.subf %92, %148 : vector<64x1xf32>
    %150 = math.exp %149 : vector<64x1xf32>
    %151 = arith.subf %119, %148 : vector<64x1xf32>
    %152 = math.exp %151 : vector<64x1xf32>
    %153 = arith.addf %150, %152 : vector<64x1xf32>
    %154 = arith.subf %146, %148 : vector<64x1xf32>
    %155 = math.exp %154 : vector<64x1xf32>
    %156 = arith.addf %153, %155 : vector<64x1xf32>
    %157 = math.log %156 : vector<64x1xf32>
    %158 = arith.addf %157, %148 : vector<64x1xf32>
    %159 = arith.subf %92, %158 : vector<64x1xf32>
    %160 = arith.subf %119, %158 : vector<64x1xf32>
    %161 = arith.subf %146, %158 : vector<64x1xf32>
    %162 = tpu.iota {dimensions = array<i32: 1>} : vector<64x3xi32>
    %cst_59 = arith.constant 0.000000e+00 : f32
    %163 = vector.broadcast %cst_59 : f32 to vector<64x3xf32>
    %c0_i32 = arith.constant 0 : i32
    %164 = vector.broadcast %c0_i32 : i32 to vector<64x3xi32>
    %165 = arith.cmpi eq, %162, %164 : vector<64x3xi32>
    %166 = vector.shape_cast %159 : vector<64x1xf32> to vector<64x1xf32>
    %167 = vector.broadcast %166 : vector<64x1xf32> to vector<64x3xf32>
    %168 = arith.select %165, %167, %163 : vector<64x3xi1>, vector<64x3xf32>
    %c1_i32 = arith.constant 1 : i32
    %169 = vector.broadcast %c1_i32 : i32 to vector<64x3xi32>
    %170 = arith.cmpi eq, %162, %169 : vector<64x3xi32>
    %171 = vector.shape_cast %160 : vector<64x1xf32> to vector<64x1xf32>
    %172 = vector.broadcast %171 : vector<64x1xf32> to vector<64x3xf32>
    %173 = arith.select %170, %172, %168 : vector<64x3xi1>, vector<64x3xf32>
    %c2_i32 = arith.constant 2 : i32
    %174 = vector.broadcast %c2_i32 : i32 to vector<64x3xi32>
    %175 = arith.cmpi eq, %162, %174 : vector<64x3xi32>
    %176 = vector.shape_cast %161 : vector<64x1xf32> to vector<64x1xf32>
    %177 = vector.broadcast %176 : vector<64x1xf32> to vector<64x3xf32>
    %178 = arith.select %175, %177, %173 : vector<64x3xi1>, vector<64x3xf32>
    %c0_60 = arith.constant 0 : index
    %c0_61 = arith.constant 0 : index
    %179 = vector.load %arg13[%c0_60, %c0_61] : memref<64x3xf32, #tpu.memory_space<vmem>>, vector<64x3xf32>
    tpu.vector_store %arg13[%c0_60, %c0_61], %178 {strides = array<i32>} : memref<64x3xf32, #tpu.memory_space<vmem>>, vector<64x3xf32>,
    %180 = math.exp %159 : vector<64x1xf32>
    %181 = vector.broadcast %0 : f32 to vector<64x1xf32>
    %182 = arith.mulf %181, %180 : vector<64x1xf32>
    %183 = vector.broadcast %1 : f32 to vector<64x1xf32>
    %184 = arith.subf %182, %183 : vector<64x1xf32>
    %185 = math.tanh %184 : vector<64x1xf32>
    %cst_62 = arith.constant 0.000000e+00 : f32
    %186 = vector.broadcast %cst_62 : f32 to vector<64x1xf32>
    %187 = arith.maximumf %185, %186 : vector<64x1xf32>
    %c0_63 = arith.constant 0 : index
    %c0_64 = arith.constant 0 : index
    %188 = vector.load %arg7[%c0_63, %c0_64] : memref<64x128xbf16, #tpu.memory_space<vmem>>, vector<64x128xbf16>
    %189 = arith.extf %188 : vector<64x128xbf16> to vector<64x128xf32>
    %190 = vector.broadcast %187 : vector<64x1xf32> to vector<64x128xf32>
    %191 = arith.mulf %190, %189 : vector<64x128xf32>
    %192 = arith.truncf %191 : vector<64x128xf32> to vector<64x128xbf16>
    %c0_65 = arith.constant 0 : index
    %c0_66 = arith.constant 0 : index
    %193 = vector.load %arg10[%c0_65, %c0_66] : memref<64x128xbf16, #tpu.memory_space<vmem>>, vector<64x128xbf16>
    tpu.vector_store %arg10[%c0_65, %c0_66], %192 {strides = array<i32>} : memref<64x128xbf16, #tpu.memory_space<vmem>>, vector<64x128xbf16>,
    %194 = math.exp %160 : vector<64x1xf32>
    %195 = vector.broadcast %0 : f32 to vector<64x1xf32>
    %196 = arith.mulf %195, %194 : vector<64x1xf32>
    %197 = vector.broadcast %1 : f32 to vector<64x1xf32>
    %198 = arith.subf %196, %197 : vector<64x1xf32>
    %199 = math.tanh %198 : vector<64x1xf32>
    %cst_67 = arith.constant 0.000000e+00 : f32
    %200 = vector.broadcast %cst_67 : f32 to vector<64x1xf32>
    %201 = arith.maximumf %199, %200 : vector<64x1xf32>
    %c0_68 = arith.constant 0 : index
    %c0_69 = arith.constant 0 : index
    %202 = vector.load %arg8[%c0_68, %c0_69] : memref<64x128xbf16, #tpu.memory_space<vmem>>, vector<64x128xbf16>
    %203 = arith.extf %202 : vector<64x128xbf16> to vector<64x128xf32>
    %204 = vector.broadcast %201 : vector<64x1xf32> to vector<64x128xf32>
    %205 = arith.mulf %204, %203 : vector<64x128xf32>
    %206 = arith.truncf %205 : vector<64x128xf32> to vector<64x128xbf16>
    %c0_70 = arith.constant 0 : index
    %c0_71 = arith.constant 0 : index
    %207 = vector.load %arg11[%c0_70, %c0_71] : memref<64x128xbf16, #tpu.memory_space<vmem>>, vector<64x128xbf16>
    tpu.vector_store %arg11[%c0_70, %c0_71], %206 {strides = array<i32>} : memref<64x128xbf16, #tpu.memory_space<vmem>>, vector<64x128xbf16>,
    %208 = math.exp %161 : vector<64x1xf32>
    %209 = vector.broadcast %0 : f32 to vector<64x1xf32>
    %210 = arith.mulf %209, %208 : vector<64x1xf32>
    %211 = vector.broadcast %1 : f32 to vector<64x1xf32>
    %212 = arith.subf %210, %211 : vector<64x1xf32>
    %213 = math.tanh %212 : vector<64x1xf32>
    %cst_72 = arith.constant 0.000000e+00 : f32
    %214 = vector.broadcast %cst_72 : f32 to vector<64x1xf32>
    %215 = arith.maximumf %213, %214 : vector<64x1xf32>
    %c0_73 = arith.constant 0 : index
    %c0_74 = arith.constant 0 : index
    %216 = vector.load %arg9[%c0_73, %c0_74] : memref<64x128xbf16, #tpu.memory_space<vmem>>, vector<64x128xbf16>
    %217 = arith.extf %216 : vector<64x128xbf16> to vector<64x128xf32>
    %218 = vector.broadcast %215 : vector<64x1xf32> to vector<64x128xf32>
    %219 = arith.mulf %218, %217 : vector<64x128xf32>
    %220 = arith.truncf %219 : vector<64x128xf32> to vector<64x128xbf16>
    %c0_75 = arith.constant 0 : index
    %c0_76 = arith.constant 0 : index
    %221 = vector.load %arg12[%c0_75, %c0_76] : memref<64x128xbf16, #tpu.memory_space<vmem>>, vector<64x128xbf16>
    tpu.vector_store %arg12[%c0_75, %c0_76], %220 {strides = array<i32>} : memref<64x128xbf16, #tpu.memory_space<vmem>>, vector<64x128xbf16>,
    return
  }
  func.func @transform_0(%arg0: i32) -> i32 {
    %c0_i32 = arith.constant 0 : i32
    %c0_i32_0 = arith.constant 0 : i32
    return %c0_i32 : i32
  }
  func.func @transform_1(%arg0: i32) -> i32 {
    %c0_i32 = arith.constant 0 : i32
    %c0_i32_0 = arith.constant 0 : i32
    return %c0_i32 : i32
  }
  func.func @transform_2(%arg0: i32) -> i32 {
    %c0_i32 = arith.constant 0 : i32
    %c0_i32_0 = arith.constant 0 : i32
    return %c0_i32 : i32
  }
  func.func @transform_3(%arg0: i32) -> i32 {
    %c0_i32 = arith.constant 0 : i32
    %c0_i32_0 = arith.constant 0 : i32
    return %c0_i32 : i32
  }
  func.func @transform_4(%arg0: i32) -> (i32, i32) {
    %c0_i32 = arith.constant 0 : i32
    %c0_i32_0 = arith.constant 0 : i32
    %c0_i32_1 = arith.constant 0 : i32
    return %c0_i32, %c0_i32_0 : i32, i32
  }
  func.func @transform_5(%arg0: i32) -> (i32, i32) {
    %c0_i32 = arith.constant 0 : i32
    %c0_i32_0 = arith.constant 0 : i32
    %c0_i32_1 = arith.constant 0 : i32
    return %c0_i32, %c0_i32_0 : i32, i32
  }
  func.func @transform_6(%arg0: i32) -> (i32, i32) {
    %c0_i32 = arith.constant 0 : i32
    %c0_i32_0 = arith.constant 0 : i32
    return %arg0, %c0_i32 : i32, i32
  }
  func.func @transform_7(%arg0: i32) -> (i32, i32) {
    %c0_i32 = arith.constant 0 : i32
    %c0_i32_0 = arith.constant 0 : i32
    return %arg0, %c0_i32 : i32, i32
  }
  func.func @transform_8(%arg0: i32) -> (i32, i32) {
    %c0_i32 = arith.constant 0 : i32
    %c0_i32_0 = arith.constant 0 : i32
    return %arg0, %c0_i32 : i32, i32
  }
  func.func @transform_9(%arg0: i32) -> (i32, i32) {
    %c0_i32 = arith.constant 0 : i32
    %c0_i32_0 = arith.constant 0 : i32
    return %arg0, %c0_i32 : i32, i32
  }
  func.func @transform_10(%arg0: i32) -> (i32, i32) {
    %c0_i32 = arith.constant 0 : i32
    %c0_i32_0 = arith.constant 0 : i32
    return %arg0, %c0_i32 : i32, i32
  }
  func.func @transform_11(%arg0: i32) -> (i32, i32) {
    %c0_i32 = arith.constant 0 : i32
    %c0_i32_0 = arith.constant 0 : i32
    return %arg0, %c0_i32 : i32, i32
  }
  func.func @transform_12(%arg0: i32) -> (i32, i32) {
    %c0_i32 = arith.constant 0 : i32
    %c0_i32_0 = arith.constant 0 : i32
    return %arg0, %c0_i32 : i32, i32
  }
}

</mosaic_0001>

<bundles_post_ra>
// kernel: tpu_custom_call.1
= control target key start
LH: loop header
LB: loop body
LE: loop exit
PB: predicated region body
PF: predicated region fallthrough
CT: control target
= control target key end

     0   :  { %s4791_s0 = inlined_call_operand.hbm [shape: f32[3], index: 0, kind: input, shape index: {}]   ;;  %s4792_s1 = inlined_call_operand.vmem [shape: f32[3], index: 1, kind: input, shape index: {}]   ;;  %s4793_s2 = inlined_call_operand.hbm [shape: f32[3], index: 2, kind: input, shape index: {}]   ;;  %s4794_s3 = inlined_call_operand.hbm [shape: f32[3], index: 3, kind: input, shape index: {}]   ;;  %s4795_s4 = inlined_call_operand.vmem [shape: f32[3,3], index: 4, kind: input, shape index: {}]   ;;  %s4796_s5 = inlined_call_operand.vmem [shape: f32[3,3], index: 5, kind: input, shape index: {}]   ;;  %s4797_s6 = inlined_call_operand.hbm [shape: bf16[256,128], index: 6, kind: input, shape index: {}]   ;;  %s4798_s7 = inlined_call_operand.hbm [shape: bf16[256,128], index: 7, kind: input, shape index: {}]   ;;  %s4799_s8 = inlined_call_operand.hbm [shape: bf16[256,128], index: 8, kind: input, shape index: {}]   ;;  %s4800_s9 = inlined_call_operand.hbm [shape: bf16[256,128], index: 9, kind: output, shape index: {0}]   ;;  %s4801_s10 = inlined_call_operand.hbm [shape: bf16[256,128], index: 10, kind: output, shape index: {1}]   ;;  %s4802_s11 = inlined_call_operand.hbm [shape: bf16[256,128], index: 11, kind: output, shape index: {2}]   ;;  %s4803_s12 = inlined_call_operand.vmem [shape: f32[256,3], index: 12, kind: output, shape index: {3}]  }
   0x1   :  { %4838 = sst [smem:[#allocation65_spill]] %s4791_s0 }
   0x2   :  { %4839 = sst [smem:[#allocation66_spill]] %s4792_s1 }
   0x3   :  { %4840 = sst [smem:[#allocation67_spill]] %s4793_s2 }
   0x4   :  { %4841 = sst [smem:[#allocation68_spill]] %s4795_s4 }
   0x5   :  { %4842 = sst [smem:[#allocation69_spill]] %s4800_s9 }
   0x6   :  { %4843 = sst [smem:[#allocation70_spill]] %s4801_s10 }
   0x7   :  { %4844 = sst [smem:[#allocation71_spill]] %s4802_s11 }
   0x8   :  { %18 = vsyncpa [#allocation5], 0 }
   0x9   :  { %19 = vsyncpa [#allocation6], 0 }
   0xa   :  { %20 = vsyncpa [#allocation9], 0 }
   0xb   :  { %21 = vsyncpa [#allocation12], 0 }
   0xc   :  { %22 = vsyncpa [#allocation3], 0 }
   0xd   :  { %24 = vsyncpa [#allocation3 + $0x1], 0 }
   0xe   :  { %25 = vsyncpa [#allocation16], 0 }
   0xf   :  { %27 = vsyncpa [#allocation16 + $0x1], 0 }
  0x10   :  { %28 = vsyncpa [#allocation4], 0 }
  0x11   :  { %30 = vsyncpa [#allocation4 + $0x1], 0 }
  0x12   :  { %31 = vsyncpa [#allocation20], 0 }
  0x13   :  { %33 = vsyncpa [#allocation20 + $0x1], 0  ;;  %s3326_s21 = smov 0   ;;  %s3328_s22 = smov 0  }
  0x14   :  { %s3330_s23 = smov 0   ;;  %s3332_s24 = smov 0  }
  0x15 LB: > { %4845 = sst [smem:[#allocation30_spill]] %s3231_s21  ;;  %s3350_s28 = sadd.s32 4294967295, %s3243_s24   ;;  %s3243_s24 = sphi %s3332_s24, %s4956_s24   ;;  %s3239_s23 = sphi %s3330_s23, %s4960_s23   ;;  %s3235_s22 = sphi %s3328_s22, %s4959_s22   ;;  %s3231_s21 = sphi %s3326_s21, %s4958_s21  }
  0x16   : > { %4846 = sst [smem:[#allocation31_spill]] %s3243_s24  ;;  %p2206_p0 = scmp.ge.s32.totalorder %s3243_s24, 1 }
  0x17   : > { %s4847_s4 = sld [smem:[#allocation68_spill]]  ;;  %p4816_p1 = scmp.eq.s32.totalorder %s3350_s28, 0 }
  0x18   : > { %p352_p2 = scmp.lt.s32.totalorder %s3243_s24, 5  ;;  %s4805_s13 = sadd.s32 4294967294, %s3243_s24  }
  0x19   : > { %s3369_s14 = sadd.s32 1, %s3243_s24   ;;  %s3245_s15 = smov [#allocation8]  }
  0x1a   : > { %p3355_p3 = pnand %p2206_p0, %p352_p2  ;;  %4850 = sst [smem:[#allocation32_spill]] %s3369_s14 }
  0x1b   : > { %s4851_s2 = sld [smem:[#allocation67_spill]] }
  0x1c   : > { %s4848_s29 = scalar_select %p3355_p3, 1, 0 }
  0x1d   : > { %s403_s27 = sshll.u32 %s4847_s4, 4  ;;  %p2542_p4 = pneg %p3355_p3  ;;  %s404_s27 = int_to_ptr.vmem [resolvable:$true] %s403_s27 }
  0x1e   : > { %s2952_s18 = scalar_lea.vmem %s404_s27, 64  ;;  %p2960_p10 = scmp.lt.s32.totalorder %s404_s27, %s404_s27 }
  0x1f   : > { %p3363_p5 = pnand %p2542_p4, %p4816_p1  ;;  %p2953_p6 = scmp.ne.s32.totalorder %s404_s27, %s2952_s18 }
  0x20   : > { %p2961_p11 = scmp.lt.s32.totalorder %s2952_s18, %s2952_s18 }
  0x21   : > { %s4849_s30 = scalar_select %p3363_p5, 1, 0 }
  0x22   : > { %2551 = dma.hbm_to_smem (!%p3363_p5), %s4851_s2, 16, %s3245_s15, [#allocation9]  }
  0x23   : > { %p4804_p7 = pneg %p3363_p5  ;;  %p2962_p12 = por %p2961_p11, %p2960_p10 }
  0x25   : > { %p2955_p8 = pnand %p4804_p7, %p2953_p6 }
  0x27   : > { %p2956_p9 = pneg %p2955_p8 }
  0x29   : > { %p2963_p13 = pnand %p2962_p12, %p2956_p9 }
  0x2b   : > { %2966 = shalt.err (!%p2963_p13)
}
  0x2c   : > { %s3246_s19 = smov [#allocation11]   ;;  %s169_s20 = ssub.s32 %s3243_s24, %s3369_s14 }
  0x2d   : > { %2557 = dma.vmem_to_smem (!%p3363_p5), %s404_s27, 64, %s3246_s19, [#allocation12]  }
  0x2e   : > { %s172_s25 = sadd.s32 1, %s3239_s23  ;;  %p170_p0 = scmp.eq.s32.totalorder %s169_s20, 0 }
  0x2f   : > { %p179_p2 = scmp.ne.s32.totalorder %s3239_s23, %s3235_s22  ;;  %p180_p4 = scmp.eq.s32.totalorder %s3243_s24, 0 }
  0x30   : > { %p185_p6 = scmp.ne.s32.totalorder %s3235_s22, %s3231_s21  ;;  %p261_p10 = scmp.eq.s32.totalorder %s3350_s28, 3 }
  0x31   : > { %s3392_s26 = scalar_select %p170_p0, %s3239_s23, %s172_s25  }
  0x32   : > { %p181_p8 = por %p180_p4, %p179_p2  ;;  %p3396_p9 = por %p4816_p1, %p185_p6 }
  0x33   : > { %4852 = sst [smem:[#allocation33_spill]] %s3392_s26  ;;  %p267_p11 = scmp.eq.s32.totalorder %s4805_s13, 3 }
  0x34   : > { %s4853_s15 = scalar_select %p3396_p9, 1, 0 }
  0x35   : > { %p2587_p12 = scmp.lt.s32.totalorder %s3243_s24, 4  ;;  %s4806_s27 = sand.u32 1, %s3239_s23  }
  0x36   : > { %p3405_p13 = por %p261_p10, %p179_p2  ;;  %p3409_p7 = por %p267_p11, %p185_p6 }
  0x37   : > { %s3415_s18 = sshll.u32 %s4806_s27, 5  ;;  %s3418_s19 = sshll.u32 %s3243_s24, 9 }
  0x38   : > { %s4854_s16 = scalar_select %p3405_p13, 1, 0 }
  0x39   : > { %s4855_s17 = scalar_select %p3409_p7, 1, 0 }
  0x3a   : > { %p3420_p0 = pnand %p2587_p12, %p181_p8  ;;  %s446_s25 = sand.u32 1, %s3243_s24  }
  0x3b   : > { %4856 = sst [smem:[#allocation34_spill]] %s4855_s17  ;;  %s3429_s4 = scalar_lea.hbm %s4798_s7, %s3418_s19 }
  0x3c   : > { %s450_s27 = scalar_lea.vmem [#allocation15], %s3415_s18  ;;  %s4858_s1 = sld [smem:[#allocation66_spill]] }
  0x3d   : > { %s457_s26 = sshll.u32 %s450_s27, 4  ;;  %s3437_s11 = scalar_lea.sflag [#allocation16], %s446_s25  ;;  %s3432_s26 = int_to_ptr.vmem [resolvable:$true] %s457_s26 }
  0x3e   : > { %s2967_s10 = scalar_lea.hbm %s3429_s4, 512  ;;  %p3443_p4 = pneg %p3420_p0 }
  0x3f   : > { %p2968_p2 = scmp.ne.s32.totalorder %s3429_s4, %s2967_s10  ;;  %s2972_s24 = scalar_lea.hbm %s4798_s7, 2048 }
  0x40   : > { %p2973_p10 = scmp.lt.s32.totalorder %s3429_s4, %s4798_s7  ;;  %p2974_p11 = scmp.lt.s32.totalorder %s2972_s24, %s2967_s10 }
  0x41   : > { %p2970_p6 = pnand %p3443_p4, %p2968_p2 }
  0x42   : > { %s374_s21 = sshll.u32 %s4858_s1, 4  ;;  %p2975_p12 = por %p2974_p11, %p2973_p10  ;;  %s375_s21 = int_to_ptr.vmem [resolvable:$true] %s374_s21 }
  0x43   : > { %p2971_p8 = pneg %p2970_p6 }
  0x45   : > { %p2976_p1 = pnand %p2975_p12, %p2971_p8 }
  0x47   : > { %2979 = shalt.err (!%p2976_p1)
}
  0x48   : > { %s2980_s17 = scalar_lea.vmem %s3432_s26, 512  ;;  %s3247_s25 = smov [#allocation15]  }
  0x49   : > { %p2981_p7 = scmp.ne.s32.totalorder %s3432_s26, %s2980_s17  ;;  %s2985_s13 = sshll.u32 %s3247_s25, 4  ;;  %s2986_s13 = int_to_ptr.vmem [resolvable:$false] %s2985_s13 }
  0x4a   : > { %s2987_s27 = scalar_lea.vmem %s2986_s13, 1024  ;;  %p2988_p13 = scmp.lt.s32.totalorder %s3432_s26, %s2986_s13 }
  0x4b   : > { %p2983_p2 = pnand %p2981_p7, %p3443_p4  ;;  %p2989_p9 = scmp.lt.s32.totalorder %s2987_s27, %s2980_s17 }
  0x4d   : > { %p2984_p6 = pneg %p2983_p2  ;;  %p2990_p3 = por %p2989_p9, %p2988_p13 }
  0x4f   : > { %p2991_p5 = pnand %p2990_p3, %p2984_p6 }
  0x51   : > { %2994 = shalt.err (!%p2991_p5)
}
  0x52   : > { %s4822_s9 = smov 64   ;;  %s3249_s10 = smov 4  }
  0x53   : > { %2567 = dma.hbm_to_vmem [thread:$0]  (!%p3420_p0), %s3429_s4, 512, %s3432_s26, %s3437_s11, %s4822_s9, %s4822_s9, %s3249_s10  }
  0x54   : > { %s3250_s24 = smov [#allocation2]   ;;  %p4860_p1 = scmp.ne.s32.totalorder %s4849_s30, 0 }
  0x55   : > { %s4861_s0 = sld [smem:[#allocation65_spill]]  ;;  %s3006_s27 = scalar_lea.vmem %s375_s21, 16 }
  0x56   : > { %p3007_p3 = scmp.ne.s32.totalorder %s375_s21, %s3006_s27  ;;  %p4862_p5 = pneg %p4860_p1 }
  0x57   : > { %p3014_p13 = scmp.lt.s32.totalorder %s375_s21, %s375_s21  ;;  %p3015_p8 = scmp.lt.s32.totalorder %s3006_s27, %s3006_s27 }
  0x58   : > { %p3009_p7 = pnand %p3007_p3, %p4862_p5 }
  0x59   : > { %p3016_p10 = por %p3015_p8, %p3014_p13 }
  0x5a   : > { %p3010_p9 = pneg %p3009_p7 }
  0x5b   : > { %2545 = dma.hbm_to_smem (!%p4860_p1), %s4861_s0, 16, %s3250_s24, [#allocation5]  }
  0x5c   : > { %p3017_p11 = pnand %p3016_p10, %p3010_p9 }
  0x5e   : > { %3020 = shalt.err (!%p3017_p11)
}
  0x5f   : > { %s3251_s4 = smov [#allocation7]   ;;  %s414_s14 = sshll.u32 %s4796_s5, 4  ;;  %s415_s14 = int_to_ptr.vmem [resolvable:$true] %s414_s14 }
  0x60   : > { %2548 = dma.vmem_to_smem (!%p4860_p1), %s375_s21, 16, %s3251_s4, [#allocation6]  }
  0x61   : > { %s3252_s17 = smov [#allocation10]   ;;  %s3032_s27 = scalar_lea.vmem %s415_s14, 64 }
  0x62   : > { %2554 = dma.hbm_to_smem (!%p4860_p1), %s4794_s3, 16, %s3252_s17, [#allocation9]  }
  0x63   : > { %p3033_p12 = scmp.ne.s32.totalorder %s415_s14, %s3032_s27  ;;  %p4863_p2 = pmov %p4862_p5 }
  0x64   : > { %p3040_p5 = scmp.lt.s32.totalorder %s415_s14, %s415_s14  ;;  %p3041_p7 = scmp.lt.s32.totalorder %s3032_s27, %s3032_s27 }
  0x65   : > { %p3035_p6 = pnand %p3033_p12, %p4863_p2 }
  0x66   : > { %p3042_p9 = por %p3041_p7, %p3040_p5 }
  0x67   : > { %p3036_p3 = pneg %p3035_p6 }
  0x69   : > { %p3043_p13 = pnand %p3042_p9, %p3036_p3 }
  0x6b   : > { %3046 = shalt.err (!%p3043_p13)
}
  0x6c   : > { %s3253_s21 = smov [#allocation13]   ;;  %s3500_s24 = scalar_lea.hbm %s4797_s6, %s3418_s19 }
  0x6d   : > { %2560 = dma.vmem_to_smem (!%p4860_p1), %s415_s14, 64, %s3253_s21, [#allocation12]  }
  0x6e   : > { %s429_s17 = scalar_lea.vmem [#allocation14], %s3415_s18  ;;  %s4864_s13 = sand.u32 1, %s3239_s23  }
  0x6f   : > { %s436_s25 = sshll.u32 %s429_s17, 4  ;;  %s426_s27 = scalar_lea.sflag [#allocation3], %s4864_s13  ;;  %s3503_s25 = int_to_ptr.vmem [resolvable:$true] %s436_s25 }
  0x70   : > { %s3047_s30 = scalar_lea.hbm %s3500_s24, 512  ;;  %s3052_s4 = scalar_lea.hbm %s4797_s6, 2048 }
  0x71   : > { %p3048_p8 = scmp.ne.s32.totalorder %s3500_s24, %s3047_s30  ;;  %p3053_p1 = scmp.lt.s32.totalorder %s3500_s24, %s4797_s6 }
  0x72   : > { %p3054_p12 = scmp.lt.s32.totalorder %s3052_s4, %s3047_s30 }
  0x73   : > { %p3050_p10 = pnand %p3048_p8, %p3443_p4 }
  0x74   : > { %p3055_p2 = por %p3054_p12, %p3053_p1 }
  0x75   : > { %p3051_p11 = pneg %p3050_p10 }
  0x77   : > { %p3056_p6 = pnand %p3055_p2, %p3051_p11 }
  0x79   : > { %3059 = shalt.err (!%p3056_p6)
}
  0x7a   : > { %s3060_s17 = scalar_lea.vmem %s3503_s25, 512  ;;  %s3254_s13 = smov [#allocation14]  }
  0x7b   : > { %p3061_p3 = scmp.ne.s32.totalorder %s3503_s25, %s3060_s17  ;;  %s3065_s14 = sshll.u32 %s3254_s13, 4  ;;  %s3066_s14 = int_to_ptr.vmem [resolvable:$false] %s3065_s14 }
  0x7c   : > { %s3067_s21 = scalar_lea.vmem %s3066_s14, 1024  ;;  %p3068_p9 = scmp.lt.s32.totalorder %s3503_s25, %s3066_s14 }
  0x7d   : > { %p3063_p5 = pnand %p3061_p3, %p3443_p4  ;;  %p3069_p13 = scmp.lt.s32.totalorder %s3067_s21, %s3060_s17 }
  0x7f   : > { %p3064_p7 = pneg %p3063_p5  ;;  %p3070_p8 = por %p3069_p13, %p3068_p9 }
  0x81   : > { %p3071_p10 = pnand %p3070_p8, %p3064_p7 }
  0x83   : > { %3074 = shalt.err (!%p3071_p10)
}
  0x84   : > { %s4865_s9 = smov 64   ;;  %s3534_s26 = scalar_lea.hbm %s4799_s8, %s3418_s19 }
  0x85   : > { %2564 = dma.hbm_to_vmem [thread:$0]  (!%p3420_p0), %s3500_s24, 512, %s3503_s25, %s426_s27, %s4865_s9, %s4865_s9, %s3249_s10  }
  0x86   : > { %s471_s17 = scalar_lea.vmem [#allocation17], %s3415_s18  ;;  %s3075_s14 = scalar_lea.hbm %s3534_s26, 512 }
  0x87   : > { %s478_s13 = sshll.u32 %s471_s17, 4  ;;  %p3076_p11 = scmp.ne.s32.totalorder %s3534_s26, %s3075_s14  ;;  %s479_s13 = int_to_ptr.vmem [resolvable:$true] %s478_s13 }
  0x88   : > { %s3080_s24 = scalar_lea.hbm %s4799_s8, 2048  ;;  %p3081_p2 = scmp.lt.s32.totalorder %s3534_s26, %s4799_s8 }
  0x89   : > { %p3078_p1 = pnand %p3076_p11, %p3443_p4  ;;  %p3082_p6 = scmp.lt.s32.totalorder %s3080_s24, %s3075_s14 }
  0x8b   : > { %p3079_p12 = pneg %p3078_p1  ;;  %p3083_p3 = por %p3082_p6, %p3081_p2 }
  0x8d   : > { %p3084_p5 = pnand %p3083_p3, %p3079_p12 }
  0x8f   : > { %3087 = shalt.err (!%p3084_p5)
}
  0x90   : > { %s3088_s18 = scalar_lea.vmem %s479_s13, 512  ;;  %s3255_s19 = smov [#allocation17]  }
  0x91   : > { %p3089_p7 = scmp.ne.s32.totalorder %s479_s13, %s3088_s18  ;;  %s3093_s30 = sshll.u32 %s3255_s19, 4  ;;  %s3094_s30 = int_to_ptr.vmem [resolvable:$false] %s3093_s30 }
  0x92   : > { %s3095_s4 = scalar_lea.vmem %s3094_s30, 1024  ;;  %p3096_p8 = scmp.lt.s32.totalorder %s479_s13, %s3094_s30 }
  0x93   : > { %p3091_p9 = pnand %p3089_p7, %p3443_p4  ;;  %p3097_p10 = scmp.lt.s32.totalorder %s3095_s4, %s3088_s18 }
  0x95   : > { %p3092_p13 = pneg %p3091_p9  ;;  %p3098_p11 = por %p3097_p10, %p3096_p8 }
  0x97   : > { %p3099_p1 = pnand %p3098_p11, %p3092_p13 }
  0x99   : > { %3102 = shalt.err (!%p3099_p1)
}
  0x9a   : > { %2570 = dma.hbm_to_vmem [thread:$0]  (!%p3420_p0), %s3534_s26, 512, %s479_s13, %s3437_s11, %s4865_s9, %s4865_s9, %s3249_s10  }
  0x9b   : > { %p4866_p4 = scmp.ne.s32.totalorder %s4848_s29, 0 }
  0x9d   : > { %490 = sbr.rel (%p4866_p4) target bundleno = 679 (0x2a7), region = 56 }
  0xa2   : > { %p4867_p12 = scmp.eq.s32.totalorder %s3350_s28, 0 }
  0xa4   : > { %3198 = dma.done.wait (%p4867_p12), [#allocation5], 16   ;;  %p4868_p2 = pmov %p4867_p12 }
  0xa6   : > { %3200 = vsyncadd (%p4868_p2), [#allocation5], 4294967280  ;;  %p4869_p6 = pmov %p4868_p2 }
  0xa7   : > { %p4870_p3 = pmov %p4868_p2 }
  0xa8   : > { %3202 = dma.done.wait (%p4869_p6), [#allocation6], 16  }
  0xa9   : > { %3204 = vsyncadd (%p4870_p3), [#allocation6], 4294967280  ;;  %p4871_p5 = pmov %p4868_p2 }
  0xaa   : > { %p4872_p0 = pmov %p4868_p2 }
  0xab   : > { %3206 = dma.done.wait (%p4871_p5), [#allocation9], 32  }
  0xac   : > { %3208 = vsyncadd (%p4872_p0), [#allocation9], 4294967264  ;;  %p4873_p7 = pmov %p4872_p0 }
  0xad   : > { %p4874_p9 = pmov %p4872_p0 }
  0xae   : > { %3210 = dma.done.wait (%p4873_p7), [#allocation12], 128  }
  0xaf   : > { %3212 = vsyncadd (%p4874_p9), [#allocation12], 4294967168  ;;  %s3576_s0 = sand.u32 1, %s3235_s22   ;;  %p4875_p13 = scmp.ne.s32.totalorder %s4853_s15, 0 }
  0xb0   : > { %s3579_s11 = sshll.u32 %s3576_s0, 5  ;;  %s517_s29 = scalar_lea.sflag [#allocation3], %s3576_s0 }
  0xb1   : > { %s3583_s20 = scalar_lea.vmem [#allocation14], %s3579_s11 }
  0xb2   : > { %3214 = dma.done.wait (%p4875_p13), %s517_s29, 512  }
  0xb3   : > { %3216 = vsyncadd (%p4875_p13), %s517_s29, 4294966784  ;;  %s4824_s2 = sand.u32 1, %s3350_s28   ;;  %s3593_s9 = scalar_lea.vmem [#allocation15], %s3579_s11 }
  0xb4   : > { %s526_s10 = scalar_lea.sflag [#allocation16], %s4824_s2 }
  0xb5   : > { %3218 = dma.done.wait (%p4875_p13), %s526_s10, 1024  }
  0xb6   : > { %3220 = vsyncadd (%p4875_p13), %s526_s10, 4294966272  ;;  %s3600_s26 = scalar_lea.vmem [#allocation17], %s3579_s11 }
  0xb7   : > { %543 = sfence }
  0xb8   : > { %v2479_v0 = vld [vmem:[%s3583_s20 + $0x8] sm:$0xff]   ;;  %v2324_v1 = vld [vmem:[%s3583_s20] sm:$0xff]   ;;  %v2480_v6 = vld [vmem:[%s3583_s20 + $0x10] sm:$0xff]   ;;  %s668_s15 = sld [smem:[#allocation7]]  ;;  %vm1529_vm1 = vcmask 23552   ;;  %p4949_p11 = scmp.ne.s32.totalorder %s4854_s16, 0 }
  0xb9   : > { %v2329_v2 = vunpack.c.l.bf16 %v2479_v0  ;;  %v2325_v3 = vunpack.c.l.bf16 %v2324_v1  ;;  %v2330_v4 = vunpack.c.h.bf16 %v2479_v0  ;;  %v2326_v5 = vunpack.c.h.bf16 %v2324_v1  ;;  %v2481_v13 = vld [vmem:[%s3583_s20 + $0x18] sm:$0xff]   ;;  %v2340_v18 = vld [vmem:[%s3593_s9] sm:$0xff]   ;;  %v2482_v23 = vld [vmem:[%s3593_s9 + $0x8] sm:$0xff]   ;;  %s694_s17 = sld [smem:[#allocation8]] }
  0xba   : > { %v2334_v11 = vunpack.c.h.bf16 %v2480_v6  ;;  %v2333_v12 = vunpack.c.l.bf16 %v2480_v6  ;;  %v2338_v16 = vunpack.c.h.bf16 %v2481_v13  ;;  %v2337_v17 = vunpack.c.l.bf16 %v2481_v13  ;;  %v2483_v28 = vld [vmem:[%s3593_s9 + $0x10] sm:$0xff]   ;;  %v2484_v33 = vld [vmem:[%s3593_s9 + $0x18] sm:$0xff]   ;;  %v2356_v38 = vld [vmem:[%s3600_s26] sm:$0xff]   ;;  %s704_s13 = sld [smem:[#allocation10]] }
  0xbb   : > { %v638_v7 = vmul.f32 %v2329_v2, %v2329_v2  ;;  %v636_v8 = vmul.f32 %v2325_v3, %v2325_v3  ;;  %v639_v9 = vmul.f32 %v2330_v4, %v2330_v4  ;;  %v637_v10 = vmul.f32 %v2326_v5, %v2326_v5  ;;  %v2485_v43 = vld [vmem:[%s3600_s26 + $0x8] sm:$0xff]   ;;  %v2486_v48 = vld [vmem:[%s3600_s26 + $0x10] sm:$0xff]   ;;  %v2487_v53 = vld [vmem:[%s3600_s26 + $0x18] sm:$0xff]   ;;  %s3614_s14 = sld [smem:[#allocation13 + $0x80]] }
  0xbc   : > { %v641_v14 = vmul.f32 %v2334_v11, %v2334_v11  ;;  %v640_v15 = vmul.f32 %v2333_v12, %v2333_v12  ;;  %v643_v19 = vmul.f32 %v2338_v16, %v2338_v16  ;;  %v642_v20 = vmul.f32 %v2337_v17, %v2337_v17  ;;  %s3616_s21 = sld [smem:[#allocation13 + $0x100]] }
  0xbd   : > { %648 = vadd.xlane.f32.xlu1 %v638_v7  ;;  %644 = vadd.xlane.f32.xlu0 %v636_v8  ;;  %v2342_v21 = vunpack.c.h.bf16 %v2340_v18  ;;  %v2341_v22 = vunpack.c.l.bf16 %v2340_v18  ;;  %v2346_v26 = vunpack.c.h.bf16 %v2482_v23  ;;  %v2345_v27 = vunpack.c.l.bf16 %v2482_v23  ;;  %s3618_s24 = sld [smem:[#allocation13 + $0x1]] }
  0xbe   : > { %v2350_v31 = vunpack.c.h.bf16 %v2483_v28  ;;  %v2349_v32 = vunpack.c.l.bf16 %v2483_v28  ;;  %v2354_v36 = vunpack.c.h.bf16 %v2484_v33  ;;  %v2353_v37 = vunpack.c.l.bf16 %v2484_v33  ;;  %s3620_s25 = sld [smem:[#allocation13 + $0x2]] }
  0xbf   : > { %v747_v24 = vmul.f32 %v2342_v21, %v2342_v21  ;;  %v746_v25 = vmul.f32 %v2341_v22, %v2341_v22  ;;  %v749_v29 = vmul.f32 %v2346_v26, %v2346_v26  ;;  %v748_v30 = vmul.f32 %v2345_v27, %v2345_v27  ;;  %s3622_s27 = sld [smem:[#allocation7 + $0x1]] }
  0xc0   : > { %v751_v34 = vmul.f32 %v2350_v31, %v2350_v31  ;;  %v750_v35 = vmul.f32 %v2349_v32, %v2349_v32  ;;  %v753_v39 = vmul.f32 %v2354_v36, %v2354_v36  ;;  %v752_v40 = vmul.f32 %v2353_v37, %v2353_v37  ;;  %s3624_s18 = sld [smem:[#allocation8 + $0x1]] }
  0xc1   : > { %650 = vadd.xlane.f32.xlu1 %v639_v9  ;;  %646 = vadd.xlane.f32.xlu0 %v637_v10  ;;  %v2358_v41 = vunpack.c.h.bf16 %v2356_v38  ;;  %v2357_v42 = vunpack.c.l.bf16 %v2356_v38  ;;  %v2362_v46 = vunpack.c.h.bf16 %v2485_v43  ;;  %v2361_v47 = vunpack.c.l.bf16 %v2485_v43  ;;  %s3626_s19 = sld [smem:[#allocation13 + $0x101]] }
  0xc2   : > { %v2366_v51 = vunpack.c.h.bf16 %v2486_v48  ;;  %v2365_v52 = vunpack.c.l.bf16 %v2486_v48  ;;  %v2370_v56 = vunpack.c.h.bf16 %v2487_v53  ;;  %v2369_v57 = vunpack.c.l.bf16 %v2487_v53  ;;  %s3630_s30 = sld [smem:[#allocation10 + $0x1]] }
  0xc3   : > { %v857_v44 = vmul.f32 %v2358_v41, %v2358_v41  ;;  %v856_v45 = vmul.f32 %v2357_v42, %v2357_v42  ;;  %v859_v49 = vmul.f32 %v2362_v46, %v2362_v46  ;;  %v858_v50 = vmul.f32 %v2361_v47, %v2361_v47  ;;  %s1095_s4 = ssub.f32 1.0, %s3614_s14 }
  0xc4   : > { %v861_v54 = vmul.f32 %v2366_v51, %v2366_v51  ;;  %v860_v55 = vmul.f32 %v2365_v52, %v2365_v52  ;;  %v863_v58 = vmul.f32 %v2370_v56, %v2370_v56  ;;  %v862_v59 = vmul.f32 %v2369_v57, %v2369_v57  ;;  %s1227_s29 = ssub.f32 1.0, %s3616_s21 }
  0xc5   : > { %654 = vadd.xlane.f32.xlu1 %v641_v14  ;;  %652 = vadd.xlane.f32.xlu0 %v640_v15  ;;  %v3628_v60 = vstv %s668_s15  ;;  %s3636_s10 = sld [smem:[#allocation13 + $0x82]]  ;;  %v3638_v3 = vstv %s694_s17  ;;  %v3641_v10 = vstv %s704_s13  ;;  %v3644_v11 = vstv %s3618_s24 }
  0xc6   : > { %s961_s15 = ssub.f32 1.0, %s3618_s24  ;;  %v3647_v12 = vstv %s3620_s25  ;;  %v3649_v13 = vstv %s1095_s4  ;;  %v3656_v18 = vstv %s1227_s29  ;;  %v3659_v21 = vstv %s3622_s27 }
  0xc7   : > { %s3651_s17 = sld [smem:[#allocation11 + $0x80]]  ;;  %v3662_v22 = vstv %s3624_s18  ;;  %v3674_v31 = vstv %s3614_s14 }
  0xc8   : > { %s1289_s2 = ssub.f32 1.0, %s3626_s19  ;;  %v3665_v23 = vstv %s3630_s30 }
  0xc9   : > { %658 = vadd.xlane.f32.xlu1 %v643_v19  ;;  %656 = vadd.xlane.f32.xlu0 %v642_v20  ;;  %s3667_s13 = sld [smem:[#allocation7 + $0x2]] }
  0xca   : > { %s3682_s24 = sld [smem:[#allocation8 + $0x2]]  ;;  %v3689_v41 = vstv %s1289_s2 }
  0xcb   : > { %s3691_s14 = sld [smem:[#allocation10 + $0x2]] }
  0xcc   : > { %s3711_s2 = sld [smem:[#allocation11 + $0x1]] }
  0xcd   : > { %756 = vadd.xlane.f32.xlu1 %v747_v24  ;;  %754 = vadd.xlane.f32.xlu0 %v746_v25  ;;  %v3705_v51 = vstv %s3651_s17  ;;  %s3714_s27 = sld [smem:[#allocation11 + $0x2]] }
  0xce   : > { %s3719_s18 = sld [smem:[#allocation2 + $0x2]] }
  0xcf   : > { %v3709_v57 = vstv %s3667_s13  ;;  %s3726_s30 = sld [smem:[#allocation11 + $0x82]] }
  0xd0   : > { %s3737_s4 = sld [smem:[#allocation11 + $0x100]] }
  0xd1   : > { %760 = vadd.xlane.f32.xlu1 %v749_v29  ;;  %758 = vadd.xlane.f32.xlu0 %v748_v30  ;;  %v3671_v30 = vstv %s961_s15  ;;  %s3745_s29 = sld [smem:[#allocation11 + $0x101]] }
  0xd2   : > { %s1023_s15 = ssub.f32 1.0, %s3620_s25 }
  0xd3   : > { %s4947_s13 = sld [smem:[#allocation70_spill]] }
  0xd4   : > { %s1074_s25 = ssub.f32 0.0, %s3719_s18  ;;  %s4585_s18 = scalar_lea.vmem [#allocation19], %s3579_s11 }
  0xd5   : > { %764 = vadd.xlane.f32.xlu1 %v751_v34  ;;  %762 = vadd.xlane.f32.xlu0 %v750_v35 }
  0xd9   : > { %768 = vadd.xlane.f32.xlu1 %v753_v39  ;;  %766 = vadd.xlane.f32.xlu0 %v752_v40  ;;  %v3687_v40 = vstv %s3636_s10 }
  0xdd   : > { %866 = vadd.xlane.f32.xlu1 %v857_v44  ;;  %864 = vadd.xlane.f32.xlu0 %v856_v45 }
  0xe1   : > { %870 = vadd.xlane.f32.xlu1 %v859_v49  ;;  %868 = vadd.xlane.f32.xlu0 %v858_v50 }
  0xe5   : > { %874 = vadd.xlane.f32.xlu1 %v861_v54  ;;  %872 = vadd.xlane.f32.xlu0 %v860_v55 }
  0xe9   : > { %878 = vadd.xlane.f32.xlu1 %v863_v58  ;;  %876 = vadd.xlane.f32.xlu0 %v862_v59 }
 0x146   : > { %v649_v61 = vpop.xlane.xlu1 %648  ;;  %v645_v62 = vpop.xlane.xlu0 %644 }
 0x147   : > { %v662_v63 = vmul.f32 0.0078125, %v649_v61  ;;  %v660_v0 = vmul.f32 0.0078125, %v645_v62 }
 0x149   : > { %v672_v1 = vsub.f32 %v662_v63, %v3628_v60  ;;  %v670_v2 = vsub.f32 %v660_v0, %v3628_v60 }
 0x14a   : > { %v651_v4 = vpop.xlane.xlu1 %650  ;;  %v647_v5 = vpop.xlane.xlu0 %646 }
 0x14b   : > { %v680_v6 = vadd.f32 2.7182817, %v672_v1  ;;  %v678_v7 = vadd.f32 2.7182817, %v670_v2  ;;  %v663_v8 = vmul.f32 0.0078125, %v651_v4  ;;  %v661_v9 = vmul.f32 0.0078125, %v647_v5 }
 0x14c   : > { %v3724_v4 = vstv %s3682_s24 }
 0x14d   : > { %v688_v14 = vmax.f32 %v680_v6, 2.7182817  ;;  %v686_v15 = vmax.f32 %v678_v7, 2.7182817  ;;  %v673_v16 = vsub.f32 %v663_v8, %v3628_v60  ;;  %v671_v17 = vsub.f32 %v661_v9, %v3628_v60 }
 0x14e   : > { %v655_v19 = vpop.xlane.xlu1 %654  ;;  %v653_v20 = vpop.xlane.xlu0 %652 }
 0x14f   : > { %v698_v24 = vmul.f32 %v3638_v3, %v688_v14  ;;  %v696_v25 = vmul.f32 %v3638_v3, %v686_v15  ;;  %v681_v26 = vadd.f32 2.7182817, %v673_v16  ;;  %v679_v27 = vadd.f32 2.7182817, %v671_v17 }
 0x150   : > { %v665_v28 = vmul.f32 0.0078125, %v655_v19  ;;  %v664_v29 = vmul.f32 0.0078125, %v653_v20  ;;  %v3735_v14 = vstv %s3691_s14 }
 0x151   : > { %v3677_v32 = vadd.f32 %v3641_v10, %v698_v24  ;;  %v3680_v33 = vadd.f32 %v3641_v10, %v696_v25  ;;  %v689_v34 = vmax.f32 %v681_v26, 2.7182817  ;;  %v687_v35 = vmax.f32 %v679_v27, 2.7182817 }
 0x152   : > { %v675_v36 = vsub.f32 %v665_v28, %v3628_v60  ;;  %v674_v37 = vsub.f32 %v664_v29, %v3628_v60  ;;  %v659_v38 = vpop.xlane.xlu1 %658  ;;  %v657_v39 = vpop.xlane.xlu0 %656  ;;  %v3743_v25 = vstv %s3616_s21  ;;  %s1157_s21 = ssub.f32 1.0, %s3636_s10  ;;  %s3256_s10 = smov [#allocation18]  }
 0x153   : > { %4876 = vst [vmem:[#allocation35_spill] sm:$0xff] %v3677_v32  ;;  %2637 = vlog2.f32 %v3677_v32  ;;  %v699_v42 = vmul.f32 %v3638_v3, %v689_v34  ;;  %v697_v43 = vmul.f32 %v3638_v3, %v687_v35  ;;  %v667_v44 = vmul.f32 0.0078125, %v659_v38 }
 0x154   : > { %2639 = vlog2.f32 %v3680_v33  ;;  %v683_v45 = vadd.f32 2.7182817, %v675_v36  ;;  %v682_v46 = vadd.f32 2.7182817, %v674_v37  ;;  %v666_v47 = vmul.f32 0.0078125, %v657_v39 }
 0x155   : > { %v3698_v48 = vadd.f32 %v3641_v10, %v699_v42  ;;  %v3701_v49 = vadd.f32 %v3641_v10, %v697_v43  ;;  %v677_v50 = vsub.f32 %v667_v44, %v3628_v60  ;;  %v3758_v37 = vstv %s3626_s19  ;;  %s2236_s19 = sshll.u32 %s3350_s28, 3 }
 0x156   : > { %v691_v52 = vmax.f32 %v683_v45, 2.7182817  ;;  %v690_v53 = vmax.f32 %v682_v46, 2.7182817  ;;  %v676_v54 = vsub.f32 %v666_v47, %v3628_v60  ;;  %v757_v55 = vpop.xlane.xlu1 %756  ;;  %v755_v56 = vpop.xlane.xlu0 %754  ;;  %p4301_p8 = scmp.lt.s32.totalorder %s2236_s19, 31 }
 0x157   : > { %2641 = vlog2.f32 %v3698_v48  ;;  %v685_v58 = vadd.f32 2.7182817, %v677_v50  ;;  %v771_v59 = vmul.f32 0.0078125, %v757_v55  ;;  %v770_v61 = vmul.f32 0.0078125, %v755_v56 }
 0x158   : > { %2643 = vlog2.f32 %v3701_v49  ;;  %v701_v62 = vmul.f32 %v3638_v3, %v691_v52  ;;  %v700_v60 = vmul.f32 %v3638_v3, %v690_v53  ;;  %v684_v63 = vadd.f32 2.7182817, %v676_v54  ;;  %s4962_s19 = smov (!%p4301_p8, %s2236_s19), 31 }
 0x159   : > { %v693_v0 = vmax.f32 %v685_v58, 2.7182817  ;;  %v781_v1 = vsub.f32 %v771_v59, %v3659_v21  ;;  %v780_v2 = vsub.f32 %v770_v61, %v3659_v21  ;;  %v3772_v53 = vstv %s1023_s15  ;;  %s2237_s17 = sshll.u32 %s4962_s19, 3  ;;  %s1877_s15 = scalar_lea.sflag [#allocation4], %s3576_s0 }
 0x15a   : > { %v3729_v5 = vadd.f32 %v3641_v10, %v701_v62  ;;  %v3732_v6 = vadd.f32 %v3641_v10, %v700_v60  ;;  %v692_v7 = vmax.f32 %v684_v63, 2.7182817  ;;  %v761_v8 = vpop.xlane.xlu1 %760  ;;  %v759_v9 = vpop.xlane.xlu0 %758  ;;  %v3777_v62 = vstv %s3711_s2  ;;  %s4355_s14 = scalar_lea.vmem %s4803_s12, %s2237_s17  ;;  %s4399_s2 = sld [smem:[#allocation2]] }
 0x15b   : > { %v703_v15 = vmul.f32 %v3638_v3, %v693_v0  ;;  %v789_v16 = vadd.f32 2.7182817, %v781_v1  ;;  %v788_v17 = vadd.f32 2.7182817, %v780_v2  ;;  %v773_v19 = vmul.f32 0.0078125, %v761_v8  ;;  %s3107_s17 = sshll.u32 %s3256_s10, 4  ;;  %s3108_s17 = int_to_ptr.vmem [resolvable:$false] %s3107_s17 }
 0x15c   : > { %4877 = vst [vmem:[#allocation36_spill] sm:$0xff] %v3729_v5  ;;  %4878 = vst [vmem:[#allocation37_spill] sm:$0xff] %v3732_v6  ;;  %2645 = vlog2.f32 %v3729_v5  ;;  %v702_v20 = vmul.f32 %v3638_v3, %v692_v7  ;;  %v772_v24 = vmul.f32 0.0078125, %v759_v9  ;;  %v3780_v60 = vstv %s3714_s27  ;;  %s4422_s27 = sld [smem:[#allocation2 + $0x1]]  ;;  %s3109_s1 = scalar_lea.vmem %s3108_s17, 1024 }
 0x15d   : > { %2647 = vlog2.f32 %v3732_v6  ;;  %v3749_v26 = vadd.f32 %v3641_v10, %v703_v15  ;;  %v797_v27 = vmax.f32 %v789_v16, 2.7182817  ;;  %v796_v28 = vmax.f32 %v788_v17, 2.7182817  ;;  %4881 = vst [vmem:[#allocation40_spill] sm:$0xff] %v3780_v60 }
 0x15e   : > { %v3753_v29 = vadd.f32 %v3641_v10, %v702_v20  ;;  %v783_v3 = vsub.f32 %v773_v19, %v3659_v21  ;;  %v782_v34 = vsub.f32 %v772_v24, %v3659_v21  ;;  %v765_v35 = vpop.xlane.xlu1 %764  ;;  %v763_v36 = vpop.xlane.xlu0 %762  ;;  %v3782_v63 = vstv %s1157_s21  ;;  %s4945_s21 = sld [smem:[#allocation69_spill]] }
 0x15f   : > { %4879 = vst [vmem:[#allocation38_spill] sm:$0xff] %v3749_v26  ;;  %2649 = vlog2.f32 %v3749_v26  ;;  %v807_v38 = vmul.f32 %v3662_v22, %v797_v27  ;;  %v806_v39 = vmul.f32 %v3662_v22, %v796_v28  ;;  %v775_v42 = vmul.f32 0.0078125, %v765_v35 }
 0x160   : > { %4880 = vst [vmem:[#allocation39_spill] sm:$0xff] %v3753_v29  ;;  %v2638_v43 = vpop.eup %2637  ;;  %2651 = vlog2.f32 %v3753_v29  ;;  %v791_v10 = vadd.f32 2.7182817, %v783_v3  ;;  %v790_v44 = vadd.f32 2.7182817, %v782_v34  ;;  %v774_v45 = vmul.f32 0.0078125, %v763_v36 }
 0x161   : > { %v2640_v46 = vpop.eup %2639  ;;  %v719_v47 = vmul.f32 0.6931472, %v2638_v43  ;;  %v3767_v50 = vadd.f32 %v3665_v23, %v807_v38  ;;  %v3770_v52 = vadd.f32 %v3665_v23, %v806_v39  ;;  %v785_v56 = vsub.f32 %v775_v42, %v3659_v21 }
 0x162   : > { %v799_v54 = vmax.f32 %v791_v10, 2.7182817  ;;  %v798_v55 = vmax.f32 %v790_v44, 2.7182817  ;;  %v784_v58 = vsub.f32 %v774_v45, %v3659_v21  ;;  %v769_v59 = vpop.xlane.xlu1 %768  ;;  %v715_v61 = vmul.f32 0.6931472, %v2640_v46  ;;  %v767_v35 = vpop.xlane.xlu0 %766 }
 0x163   : > { %v3785_v1 = vstv %s3726_s30  ;;  %v3788_v2 = vstv %s3737_s4  ;;  %v3791_v7 = vstv %s3745_s29  ;;  %v3793_v8 = vstv %s1074_s25  ;;  %s4592_s30 = scalar_lea.vmem [#allocation18], %s3579_s11  ;;  %s4616_s4 = scalar_lea.vmem [#allocation21], %s3579_s11 }
 0x164   : > { %v2642_v0 = vpop.eup %2641  ;;  %4882 = vst [vmem:[#allocation41_spill] sm:$0xff] %v3785_v1  ;;  %4883 = vst [vmem:[#allocation42_spill] sm:$0xff] %v3788_v2  ;;  %v3796_v15 = vmul.f32 %v3644_v11, %v719_v47  ;;  %2653 = vlog2.f32 %v3767_v50  ;;  %v809_v17 = vmul.f32 %v3662_v22, %v799_v54  ;;  %v808_v19 = vmul.f32 %v3662_v22, %v798_v55  ;;  %s2320_s11 = sshll.u32 %s3350_s28, 9  ;;  %s4946_s25 = smov %s4945_s21 }
 0x165   : > { %4884 = vst [vmem:[#allocation43_spill] sm:$0xff] %v3791_v7  ;;  %4885 = vst [vmem:[#allocation44_spill] sm:$0xff] %v3793_v8  ;;  %v2644_v9 = vpop.eup %2643  ;;  %v721_v16 = vmul.f32 0.6931472, %v2642_v0  ;;  %2655 = vlog2.f32 %v3770_v52  ;;  %v793_v20 = vadd.f32 2.7182817, %v785_v56  ;;  %v3803_v27 = vmul.f32 %v3647_v12, %v719_v47  ;;  %s4672_s19 = scalar_lea.hbm %s4945_s21, %s2320_s11  ;;  %s4679_s24 = scalar_lea.hbm %s4947_s13, %s2320_s11 }
 0x166   : > { %v792_v24 = vadd.f32 2.7182817, %v784_v58  ;;  %v3806_v28 = vmul.f32 %v3649_v13, %v719_v47  ;;  %v3809_v3 = vmul.f32 %v3656_v18, %v719_v47  ;;  %v3812_v34 = vmul.f32 %v3644_v11, %v715_v61  ;;  %v867_v43 = vpop.xlane.xlu1 %866  ;;  %v865_v26 = vpop.xlane.xlu0 %864 }
 0x167   : > { %4886 = vst [vmem:[#allocation45_spill] sm:$0xff] %v3803_v27  ;;  %v3815_v36 = vmul.f32 %v3647_v12, %v715_v61  ;;  %v3818_v38 = vmul.f32 %v3649_v13, %v715_v61  ;;  %v3821_v39 = vmul.f32 %v3656_v18, %v715_v61  ;;  %v717_v42 = vmul.f32 0.6931472, %v2644_v9 }
 0x168   : > { %4887 = vst [vmem:[#allocation46_spill] sm:$0xff] %v3809_v3  ;;  %v3824_v44 = vmul.f32 %v3644_v11, %v721_v16  ;;  %v3827_v45 = vadd.f32 %v3665_v23, %v809_v17  ;;  %v801_v46 = vmax.f32 %v793_v20, 2.7182817  ;;  %v800_v47 = vmax.f32 %v792_v24, 2.7182817 }
 0x169   : > { %4888 = vst [vmem:[#allocation47_spill] sm:$0xff] %v3815_v36  ;;  %4889 = vst [vmem:[#allocation48_spill] sm:$0xff] %v3821_v39  ;;  %v2646_v10 = vpop.eup %2645  ;;  %v3830_v55 = vmul.f32 %v3647_v12, %v721_v16  ;;  %v3833_v56 = vadd.f32 %v3665_v23, %v808_v19  ;;  %v777_v58 = vmul.f32 0.0078125, %v769_v59  ;;  %v776_v61 = vmul.f32 0.0078125, %v767_v35 }
 0x16a   : > { %v2648_v54 = vpop.eup %2647  ;;  %2657 = vlog2.f32 %v3827_v45  ;;  %v811_v0 = vmul.f32 %v3662_v22, %v801_v46  ;;  %v810_v9 = vmul.f32 %v3662_v22, %v800_v47  ;;  %v881_v6 = vmul.f32 0.0078125, %v867_v43 }
 0x16b   : > { %4890 = vst [vmem:[#allocation49_spill] sm:$0xff] %v3830_v55  ;;  %4891 = vst [vmem:[#allocation50_spill] sm:$0xff] %v3833_v56  ;;  %v3839_v20 = vmul.f32 %v3649_v13, %v721_v16  ;;  %v3842_v24 = vmul.f32 %v3656_v18, %v721_v16  ;;  %v954_v29 = vmul.f32 %v3644_v11, %v717_v42  ;;  %v725_v47 = vmul.f32 0.6931472, %v2646_v10 }
 0x16c   : > { %v2650_v17 = vpop.eup %2649  ;;  %v3846_v19 = vmul.f32 %v3647_v12, %v717_v42  ;;  %v1098_v35 = vmul.f32 %v3649_v13, %v717_v42  ;;  %v3850_v46 = vmul.f32 %v3656_v18, %v717_v42  ;;  %v723_v43 = vmul.f32 0.6931472, %v2648_v54 }
 0x16d   : > { %4892 = vst [vmem:[#allocation51_spill] sm:$0xff] %v3842_v24  ;;  %v2652_v59 = vpop.eup %2651  ;;  %v729_v3 = vmul.f32 0.6931472, %v2650_v17  ;;  %2659 = vlog2.f32 %v3833_v56  ;;  %v3854_v16 = vadd.f32 %v3665_v23, %v811_v0  ;;  %v3857_v8 = vadd.f32 %v3665_v23, %v810_v9 }
 0x16e   : > { %v727_v27 = vmul.f32 0.6931472, %v2652_v59  ;;  %v787_v7 = vsub.f32 %v777_v58, %v3659_v21  ;;  %v786_v2 = vsub.f32 %v776_v61, %v3659_v21  ;;  %v891_v1 = vsub.f32 %v881_v6, %v3709_v57 }
 0x16f   : > { %4893 = vst [vmem:[#allocation52_spill] sm:$0xff] %v3854_v16  ;;  %4894 = vst [vmem:[#allocation53_spill] sm:$0xff] %v3857_v8  ;;  %v3863_v42 = vmul.f32 %v3644_v11, %v729_v3  ;;  %v3866_v10 = vmul.f32 %v3647_v12, %v729_v3  ;;  %v3869_v54 = vmul.f32 %v3649_v13, %v729_v3  ;;  %2661 = vlog2.f32 %v3854_v16 }
 0x170   : > { %v3872_v0 = vmul.f32 %v3656_v18, %v729_v3  ;;  %v3875_v9 = vmul.f32 %v3644_v11, %v727_v27  ;;  %v3878_v58 = vmul.f32 %v3647_v12, %v727_v27  ;;  %v3881_v21 = vmul.f32 %v3649_v13, %v727_v27 }
 0x171   : > { %4895 = vst [vmem:[#allocation54_spill] sm:$0xff] %v3866_v10  ;;  %v3884_v6 = vmul.f32 %v3656_v18, %v727_v27  ;;  %v2654_v61 = vpop.eup %2653  ;;  %v3887_v17 = vmul.f32 %v3644_v11, %v725_v47  ;;  %v795_v3 = vadd.f32 2.7182817, %v787_v7  ;;  %v794_v59 = vadd.f32 2.7182817, %v786_v2 }
 0x172   : > { %4896 = vst [vmem:[#allocation55_spill] sm:$0xff] %v3872_v0  ;;  %4897 = vst [vmem:[#allocation56_spill] sm:$0xff] %v3878_v58  ;;  %v2656_v0 = vpop.eup %2655  ;;  %v3891_v10 = vmul.f32 %v3647_v12, %v725_v47  ;;  %v827_v60 = vmul.f32 0.6931472, %v2654_v61  ;;  %2663 = vlog2.f32 %v3857_v8  ;;  %v899_v58 = vadd.f32 2.7182817, %v891_v1 }
 0x173   : > { %4898 = vst [vmem:[#allocation57_spill] sm:$0xff] %v3884_v6  ;;  %v3895_v27 = vmul.f32 %v3649_v13, %v725_v47  ;;  %v825_v6 = vmul.f32 0.6931472, %v2656_v0  ;;  %v803_v24 = vmax.f32 %v795_v3, 2.7182817  ;;  %v3898_v5 = vmul.f32 %v3656_v18, %v725_v47 }
 0x174   : > { %4899 = vst [vmem:[#allocation58_spill] sm:$0xff] %v3891_v10  ;;  %v802_v55 = vmax.f32 %v794_v59, 2.7182817  ;;  %v3901_v2 = vmul.f32 %v3644_v11, %v723_v43  ;;  %v964_v7 = vmul.f32 %v3671_v30, %v827_v60  ;;  %v1088_v61 = vmul.f32 %v3674_v31, %v827_v60 }
 0x175   : > { %4900 = vst [vmem:[#allocation59_spill] sm:$0xff] %v3898_v5  ;;  %v3906_v8 = vmul.f32 %v3647_v12, %v723_v43  ;;  %v963_v1 = vmul.f32 %v3671_v30, %v825_v6  ;;  %v1087_v10 = vmul.f32 %v3674_v31, %v825_v6  ;;  %v880_v0 = vmul.f32 0.0078125, %v865_v26 }
 0x176   : > { %v972_v3 = vadd.f32 %v964_v7, %v954_v29  ;;  %v1106_v59 = vadd.f32 %v1098_v35, %v1088_v61  ;;  %v813_v47 = vmul.f32 %v3662_v22, %v803_v24  ;;  %v812_v5 = vmul.f32 %v3662_v22, %v802_v55 }
 0x177   : > { %4901 = vst [vmem:[#allocation60_spill] sm:$0xff] %v3906_v8  ;;  %v2658_v11 = vpop.eup %2657  ;;  %v3913_v16 = vmul.f32 %v3649_v13, %v723_v43  ;;  %v971_v39 = vadd.f32 %v963_v1, %v3812_v34  ;;  %v1105_v12 = vadd.f32 %v3818_v38, %v1087_v10  ;;  %v907_v8 = vmax.f32 %v899_v58, 2.7182817 }
 0x178   : > { %v981_v36 = vmul.f32 1.442695, %v972_v3  ;;  %v1115_v32 = vmul.f32 1.442695, %v1106_v59  ;;  %v831_v56 = vmul.f32 0.6931472, %v2658_v11  ;;  %v3918_v26 = vadd.f32 %v3665_v23, %v813_v47 }
 0x179   : > { %v979_v29 = vmul.f32 1.442695, %v971_v39  ;;  %v1113_v35 = vmul.f32 1.442695, %v1105_v12  ;;  %v3921_v24 = vadd.f32 %v3665_v23, %v812_v5  ;;  %v890_v22 = vsub.f32 %v880_v0, %v3709_v57  ;;  %v871_v0 = vpop.xlane.xlu1 %870 }
 0x17a   : > { %v2660_v13 = vpop.eup %2659  ;;  %v3925_v55 = vmul.f32 %v3656_v18, %v723_v43  ;;  %2665 = vpow2.f32 %v981_v36  ;;  %v966_v34 = vmul.f32 %v3671_v30, %v831_v56  ;;  %v1090_v38 = vmul.f32 %v3674_v31, %v831_v56 }
 0x17b   : > { %2667 = vpow2.f32 %v1115_v32  ;;  %v3930_v10 = vmul.f32 %v3687_v40, %v827_v60  ;;  %v3933_v39 = vmul.f32 %v3689_v41, %v827_v60  ;;  %v829_v23 = vmul.f32 0.6931472, %v2660_v13 }
 0x17c   : > { %2669 = vpow2.f32 %v979_v29  ;;  %v974_v5 = vadd.f32 %v966_v34, %v3824_v44  ;;  %v1108_v58 = vadd.f32 %v3839_v20, %v1090_v38  ;;  %v917_v18 = vmul.f32 %v3724_v4, %v907_v8  ;;  %v2662_v7 = vpop.eup %2661  ;;  %v869_v34 = vpop.xlane.xlu0 %868 }
 0x17d   : > { %2671 = vpow2.f32 %v1113_v35  ;;  %v965_v36 = vmul.f32 %v3671_v30, %v829_v23  ;;  %v1089_v43 = vmul.f32 %v3674_v31, %v829_v23  ;;  %v898_v32 = vadd.f32 2.7182817, %v890_v22 }
 0x17e   : > { %v3941_v61 = vmul.f32 %v3687_v40, %v825_v6  ;;  %v985_v60 = vmul.f32 1.442695, %v974_v5  ;;  %v1119_v1 = vmul.f32 1.442695, %v1108_v58  ;;  %2673 = vlog2.f32 %v3918_v26 }
 0x17f   : > { %v2664_v44 = vpop.eup %2663  ;;  %v973_v20 = vadd.f32 %v965_v36, %v3796_v15  ;;  %v1107_v8 = vadd.f32 %v3806_v28, %v1089_v43  ;;  %v835_v3 = vmul.f32 0.6931472, %v2662_v7  ;;  %2675 = vlog2.f32 %v3921_v24  ;;  %v875_v43 = vpop.xlane.xlu1 %874 }
 0x180   : > { %v3948_v59 = vmul.f32 %v3689_v41, %v825_v6  ;;  %2677 = vpow2.f32 %v985_v60  ;;  %v833_v47 = vmul.f32 0.6931472, %v2664_v44  ;;  %v3951_v11 = vadd.f32 %v3735_v14, %v917_v18 }
 0x181   : > { %v983_v12 = vmul.f32 1.442695, %v973_v20  ;;  %v1117_v29 = vmul.f32 1.442695, %v1107_v8  ;;  %v968_v35 = vmul.f32 %v3671_v30, %v835_v3  ;;  %v906_v22 = vmax.f32 %v898_v32, 2.7182817 }
 0x182   : > { %2679 = vpow2.f32 %v1119_v1  ;;  %v1092_v15 = vmul.f32 %v3674_v31, %v835_v3  ;;  %v967_v28 = vmul.f32 %v3671_v30, %v833_v47  ;;  %v883_v13 = vmul.f32 0.0078125, %v871_v0 }
 0x183   : > { %v3957_v6 = vmul.f32 %v3687_v40, %v831_v56  ;;  %2681 = vpow2.f32 %v983_v12  ;;  %v976_v38 = vadd.f32 %v968_v35, %v3887_v17  ;;  %v1091_v5 = vmul.f32 %v3674_v31, %v833_v47 }
 0x184   : > { %v3962_v58 = vmul.f32 %v3689_v41, %v831_v56  ;;  %2683 = vpow2.f32 %v1117_v29  ;;  %v1110_v18 = vadd.f32 %v3895_v27, %v1092_v15  ;;  %v975_v36 = vadd.f32 %v967_v28, %v3901_v2 }
 0x185   : > { %v989_v32 = vmul.f32 1.442695, %v976_v38  ;;  %v1109_v7 = vadd.f32 %v3913_v16, %v1091_v5  ;;  %2685 = vlog2.f32 %v3951_v11  ;;  %v916_v60 = vmul.f32 %v3724_v4, %v906_v22  ;;  %v873_v22 = vpop.xlane.xlu0 %872 }
 0x186   : > { %v1123_v1 = vmul.f32 1.442695, %v1110_v18  ;;  %v987_v17 = vmul.f32 1.442695, %v975_v36  ;;  %v893_v0 = vsub.f32 %v883_v13, %v3709_v57  ;;  %v882_v44 = vmul.f32 0.0078125, %v869_v34 }
 0x187   : > { %v2666_v56 = vpop.eup %2665  ;;  %v3971_v20 = vmul.f32 %v3687_v40, %v829_v23  ;;  %2687 = vpow2.f32 %v989_v32  ;;  %v3974_v27 = vadd.f32 %v3735_v14, %v916_v60  ;;  %v885_v2 = vmul.f32 0.0078125, %v875_v43 }
 0x188   : > { %v2668_v8 = vpop.eup %2667  ;;  %v1121_v16 = vmul.f32 1.442695, %v1109_v7  ;;  %v997_v12 = vmul.f32 %v2666_v56, %v3777_v62  ;;  %v901_v29 = vadd.f32 2.7182817, %v893_v0  ;;  %v892_v35 = vsub.f32 %v882_v44, %v3709_v57 }
 0x189   : > { %v2670_v15 = vpop.eup %2669  ;;  %v3979_v28 = vmul.f32 %v3689_v41, %v829_v23  ;;  %2689 = vpow2.f32 %v1123_v1  ;;  %v3982_v13 = vmul.f32 %v3687_v40, %v835_v3  ;;  %v3985_v34 = vmul.f32 %v3689_v41, %v835_v3 }
 0x18a   : > { %v2672_v38 = vpop.eup %2671  ;;  %2691 = vpow2.f32 %v987_v17  ;;  %v3988_v5 = vmul.f32 %v3687_v40, %v833_v47  ;;  %v3991_v18 = vmul.f32 %v3689_v41, %v833_v47  ;;  %v909_v36 = vmax.f32 %v901_v29, 2.7182817 }
 0x18b   : > { %v2674_v43 = vpop.eup %2673  ;;  %v1131_v23 = vmul.f32 %v2668_v8, %v3705_v51  ;;  %2693 = vlog2.f32 %v3974_v27  ;;  %v895_v32 = vsub.f32 %v885_v2, %v3709_v57  ;;  %v3996_v7 = vmul.f32 0.0078125, %v873_v22 }
 0x18c   : > { %v2676_v3 = vpop.eup %2675  ;;  %2695 = vpow2.f32 %v1121_v16  ;;  %v839_v60 = vmul.f32 0.6931472, %v2674_v43  ;;  %v3999_v1 = vadd.f32 %v997_v12, %v3701_v49  ;;  %v900_v17 = vadd.f32 2.7182817, %v892_v35 }
 0x18d   : > { %v2678_v0 = vpop.eup %2677  ;;  %v1130_v47 = vmul.f32 %v2672_v38, %v3705_v51  ;;  %v837_v44 = vmul.f32 0.6931472, %v2676_v3  ;;  %v996_v56 = vmul.f32 %v2670_v15, %v3777_v62  ;;  %v919_v8 = vmul.f32 %v3724_v4, %v909_v36 }
 0x18e   : > { %v970_v29 = vmul.f32 %v3671_v30, %v839_v60  ;;  %v1094_v2 = vmul.f32 %v3674_v31, %v839_v60  ;;  %v4007_v22 = vmul.f32 %v3687_v40, %v839_v60  ;;  %v4010_v16 = vmul.f32 %v3689_v41, %v839_v60 }
 0x18f   : > { %v2680_v49 = vpop.eup %2679  ;;  %v4013_v12 = vadd.f32 %v1131_v23, %v3767_v50  ;;  %v969_v35 = vmul.f32 %v3671_v30, %v837_v44  ;;  %v1093_v15 = vmul.f32 %v3674_v31, %v837_v44  ;;  %v4018_v38 = vmul.f32 %v3687_v40, %v837_v44 }
 0x190   : > { %4902 = vst [vmem:[#allocation61_spill] sm:$0xff] %v4007_v22  ;;  %4903 = vst [vmem:[#allocation62_spill] sm:$0xff] %v4010_v16  ;;  %v2682_v36 = vpop.eup %2681  ;;  %v978_v43 = vadd.f32 %v970_v29, %v3863_v42  ;;  %v1112_v3 = vadd.f32 %v3869_v54, %v1094_v2  ;;  %v4023_v22 = vmul.f32 %v3689_v41, %v837_v44  ;;  %v908_v60 = vmax.f32 %v900_v17, 2.7182817 }
 0x191   : > { %4904 = vst [vmem:[#allocation63_spill] sm:$0xff] %v4018_v38  ;;  %v2684_v16 = vpop.eup %2683  ;;  %v977_v50 = vadd.f32 %v969_v35, %v3875_v9  ;;  %v1111_v23 = vadd.f32 %v3881_v21, %v1093_v15  ;;  %v4028_v30 = vadd.f32 %v996_v56, %v3680_v33  ;;  %v4031_v31 = vadd.f32 %v3735_v14, %v919_v8 }
 0x192   : > { %4905 = vst [vmem:[#allocation64_spill] sm:$0xff] %v4023_v22  ;;  %v2686_v40 = vpop.eup %2685  ;;  %v4034_v42 = vadd.f32 %v1130_v47, %v3770_v52  ;;  %v993_v54 = vmul.f32 1.442695, %v978_v43  ;;  %v1127_v29 = vmul.f32 1.442695, %v1112_v3  ;;  %v1133_v17 = vmul.f32 %v2680_v49, %v3705_v51 }
 0x193   : > { %v903_v41 = vadd.f32 2.7182817, %v895_v32  ;;  %v1125_v44 = vmul.f32 1.442695, %v1111_v23  ;;  %v937_v2 = vmul.f32 0.6931472, %v2686_v40  ;;  %2697 = vlog2.f32 %v4031_v31 }
 0x194   : > { %v2688_v9 = vpop.eup %2687  ;;  %2699 = vpow2.f32 %v993_v54  ;;  %v991_v33 = vmul.f32 1.442695, %v977_v50  ;;  %v999_v21 = vmul.f32 %v2678_v0, %v3777_v62  ;;  %v918_v56 = vmul.f32 %v3724_v4, %v908_v60 }
 0x195   : > { %2701 = vpow2.f32 %v1127_v29  ;;  %v1026_v52 = vmul.f32 %v3772_v53, %v937_v2  ;;  %v1160_v47 = vmul.f32 %v3782_v63, %v937_v2  ;;  %v1220_v32 = vmul.f32 %v3743_v25, %v937_v2 }
 0x196   : > { %v2690_v8 = vpop.eup %2689  ;;  %v1132_v49 = vmul.f32 %v2684_v16, %v3705_v51  ;;  %v1282_v35 = vmul.f32 %v3758_v37, %v937_v2  ;;  %v998_v15 = vmul.f32 %v2682_v36, %v3777_v62  ;;  %v894_v43 = vsub.f32 %v3996_v7, %v3709_v57 }
 0x197   : > { %v4048_v0 = vpop.eup %2691  ;;  %2703 = vpow2.f32 %v1125_v44  ;;  %v1034_v3 = vadd.f32 %v1026_v52, %v3846_v19  ;;  %v1168_v60 = vadd.f32 %v1160_v47, %v3930_v10  ;;  %v1238_v50 = vadd.f32 %v3850_v46, %v1220_v32  ;;  %v4906_v44 = vld [vmem:[#allocation50_spill] sm:$0xff]  ;;  %v879_v47 = vpop.xlane.xlu1 %878 }
 0x198   : > { %v2694_v23 = vpop.eup %2693  ;;  %v4054_v40 = vadd.f32 %v1133_v17, %v3827_v45  ;;  %v1300_v16 = vadd.f32 %v3933_v39, %v1282_v35  ;;  %v4058_v36 = vadd.f32 %v999_v21, %v3698_v48  ;;  %v4061_v7 = vadd.f32 %v3735_v14, %v918_v56  ;;  %v4907_v48 = vld [vmem:[#allocation35_spill] sm:$0xff] }
 0x199   : > { %v4063_v54 = vpop.eup %2695  ;;  %2705 = vpow2.f32 %v991_v33  ;;  %v1043_v19 = vmul.f32 1.442695, %v1034_v3  ;;  %v1177_v29 = vmul.f32 1.442695, %v1168_v60  ;;  %v1247_v10 = vmul.f32 1.442695, %v1238_v50 }
 0x19a   : > { %v4066_v46 = vadd.f32 %v1132_v49, %v4906_v44  ;;  %v1309_v2 = vmul.f32 1.442695, %v1300_v16  ;;  %v935_v45 = vmul.f32 0.6931472, %v2694_v23  ;;  %2707 = vlog2.f32 %v4061_v7  ;;  %v4908_v35 = vld [vmem:[#allocation47_spill] sm:$0xff]  ;;  %v4909_v3 = vld [vmem:[#allocation48_spill] sm:$0xff] }
 0x19b   : > { %v1135_v39 = vmul.f32 %v2690_v8, %v3705_v51  ;;  %2709 = vpow2.f32 %v1043_v19  ;;  %v4071_v17 = vadd.f32 %v998_v15, %v4907_v48  ;;  %v911_v21 = vmax.f32 %v903_v41, 2.7182817 }
 0x19c   : > { %2711 = vpow2.f32 %v1177_v29  ;;  %v1025_v33 = vmul.f32 %v3772_v53, %v935_v45  ;;  %v1159_v56 = vmul.f32 %v3782_v63, %v935_v45  ;;  %v1219_v52 = vmul.f32 %v3743_v25, %v935_v45 }
 0x19d   : > { %2713 = vpow2.f32 %v1247_v10  ;;  %v1281_v32 = vmul.f32 %v3758_v37, %v935_v45  ;;  %v1001_v49 = vmul.f32 %v2688_v9, %v3777_v62  ;;  %v921_v8 = vmul.f32 %v3724_v4, %v911_v21  ;;  %v4910_v10 = vld [vmem:[#allocation52_spill] sm:$0xff] }
 0x19e   : > { %2715 = vpow2.f32 %v1309_v2  ;;  %v1033_v15 = vadd.f32 %v1025_v33, %v4908_v35  ;;  %v1167_v41 = vadd.f32 %v1159_v56, %v3941_v61  ;;  %v1237_v60 = vadd.f32 %v4909_v3, %v1219_v52 }
 0x19f   : > { %v1299_v50 = vadd.f32 %v3948_v59, %v1281_v32  ;;  %v4084_v23 = vadd.f32 %v3735_v14, %v921_v8  ;;  %v902_v16 = vadd.f32 2.7182817, %v894_v43  ;;  %v887_v19 = vmul.f32 0.0078125, %v879_v47  ;;  %v4911_v59 = vld [vmem:[#allocation36_spill] sm:$0xff] }
 0x1a0   : > { %v2698_v29 = vpop.eup %2697  ;;  %v4087_v44 = vadd.f32 %v1135_v39, %v4910_v10  ;;  %v1041_v9 = vmul.f32 1.442695, %v1033_v15  ;;  %v1175_v45 = vmul.f32 1.442695, %v1167_v41  ;;  %v1245_v2 = vmul.f32 1.442695, %v1237_v60 }
 0x1a1   : > { %v2700_v48 = vpop.eup %2699  ;;  %v1307_v21 = vmul.f32 1.442695, %v1299_v50  ;;  %v941_v33 = vmul.f32 0.6931472, %v2698_v29  ;;  %2717 = vlog2.f32 %v4084_v23  ;;  %v910_v61 = vmax.f32 %v902_v16, 2.7182817 }
 0x1a2   : > { %v2702_v56 = vpop.eup %2701  ;;  %2719 = vpow2.f32 %v1041_v9  ;;  %v4091_v52 = vadd.f32 %v1001_v49, %v4911_v59  ;;  %v1003_v43 = vmul.f32 %v2700_v48, %v3777_v62  ;;  %v897_v47 = vsub.f32 %v887_v19, %v3709_v57  ;;  %v4913_v50 = vld [vmem:[#allocation49_spill] sm:$0xff]  ;;  %v4914_v10 = vld [vmem:[#allocation51_spill] sm:$0xff]  ;;  %v877_v48 = vpop.xlane.xlu0 %876 }
 0x1a3   : > { %v1137_v39 = vmul.f32 %v2702_v56, %v3705_v51  ;;  %2721 = vpow2.f32 %v1175_v45  ;;  %v1028_v32 = vmul.f32 %v3772_v53, %v941_v33  ;;  %v1162_v8 = vmul.f32 %v3782_v63, %v941_v33  ;;  %v4916_v56 = vld [vmem:[#allocation38_spill] sm:$0xff] }
 0x1a4   : > { %v2704_v35 = vpop.eup %2703  ;;  %2723 = vpow2.f32 %v1245_v2  ;;  %v1222_v15 = vmul.f32 %v3743_v25, %v941_v33  ;;  %v1284_v41 = vmul.f32 %v3758_v37, %v941_v33  ;;  %v920_v49 = vmul.f32 %v3724_v4, %v910_v61 }
 0x1a5   : > { %v4102_v3 = vadd.f32 %v1137_v39, %v3918_v26  ;;  %v1136_v60 = vmul.f32 %v2704_v35, %v3705_v51  ;;  %2725 = vpow2.f32 %v1307_v21  ;;  %v1036_v16 = vadd.f32 %v1028_v32, %v4913_v50  ;;  %v4918_v35 = vld [vmem:[#allocation40_spill] sm:$0xff] }
 0x1a6   : > { %v2706_v19 = vpop.eup %2705  ;;  %v1170_v29 = vadd.f32 %v1162_v8, %v3957_v6  ;;  %v1240_v9 = vadd.f32 %v4914_v10, %v1222_v15  ;;  %v1302_v45 = vadd.f32 %v3962_v58, %v1284_v41  ;;  %v4110_v2 = vadd.f32 %v3735_v14, %v920_v49  ;;  %v4920_v10 = vld [vmem:[#allocation42_spill] sm:$0xff] }
 0x1a7   : > { %4912 = vst [vmem:[#allocation50_spill] sm:$0xff] %v4102_v3  ;;  %v2708_v33 = vpop.eup %2707  ;;  %v4113_v26 = vadd.f32 %v1136_v60, %v3921_v24  ;;  %v1047_v61 = vmul.f32 1.442695, %v1036_v16  ;;  %v4116_v21 = vadd.f32 %v1003_v43, %v4916_v56  ;;  %v4118_v59 = vadd.f32 2.7182817, %v897_v47  ;;  %v4919_v60 = vld [vmem:[#allocation41_spill] sm:$0xff] }
 0x1a8   : > { %v2710_v39 = vpop.eup %2709  ;;  %v1181_v6 = vmul.f32 1.442695, %v1170_v29  ;;  %v1251_v32 = vmul.f32 1.442695, %v1240_v9  ;;  %v1313_v8 = vmul.f32 1.442695, %v1302_v45  ;;  %2727 = vlog2.f32 %v4110_v2 }
 0x1a9   : > { %4915 = vst [vmem:[#allocation35_spill] sm:$0xff] %v4113_v26  ;;  %4917 = vst [vmem:[#allocation47_spill] sm:$0xff] %v4116_v21  ;;  %v2712_v58 = vpop.eup %2711  ;;  %v1059_v15 = vmul.f32 %v2710_v39, %v4918_v35  ;;  %2729 = vpow2.f32 %v1047_v61  ;;  %v939_v41 = vmul.f32 0.6931472, %v2708_v33  ;;  %v4122_v49 = vmul.f32 0.0078125, %v877_v48  ;;  %v4921_v33 = vld [vmem:[#allocation43_spill] sm:$0xff] }
 0x1aa   : > { %v2714_v24 = vpop.eup %2713  ;;  %v1193_v50 = vmul.f32 %v2712_v58, %v4919_v60  ;;  %2731 = vpow2.f32 %v1181_v6  ;;  %v4127_v47 = vmul.f32 %v2706_v19, %v3777_v62  ;;  %v4922_v39 = vld [vmem:[#allocation44_spill] sm:$0xff]  ;;  %v4923_v58 = vld [vmem:[#allocation45_spill] sm:$0xff]  ;;  %v4924_v26 = vld [vmem:[#allocation46_spill] sm:$0xff] }
 0x1ab   : > { %v2716_v16 = vpop.eup %2715  ;;  %v1067_v29 = vadd.f32 %v1059_v15, %v3999_v1  ;;  %v1263_v9 = vmul.f32 %v2714_v24, %v4920_v10  ;;  %2733 = vpow2.f32 %v1251_v32  ;;  %v1027_v45 = vmul.f32 %v3772_v53, %v939_v41 }
 0x1ac   : > { %v1201_v48 = vadd.f32 %v1193_v50, %v4013_v12  ;;  %v1325_v61 = vmul.f32 %v2716_v16, %v4921_v33  ;;  %2735 = vpow2.f32 %v1313_v8  ;;  %v1161_v56 = vmul.f32 %v3782_v63, %v939_v41 }
 0x1ad   : > { %v4136_v6 = vmul.f32 %v4922_v39, %v1067_v29  ;;  %v1271_v19 = vadd.f32 %v1263_v9, %v3951_v11  ;;  %v1035_v43 = vadd.f32 %v1027_v45, %v4923_v58  ;;  %v1221_v1 = vmul.f32 %v3743_v25, %v939_v41 }
 0x1ae   : > { %v2718_v15 = vpop.eup %2717  ;;  %v4142_v32 = vmul.f32 %v1201_v48, %v4922_v39  ;;  %v1169_v12 = vadd.f32 %v1161_v56, %v3971_v20  ;;  %v1283_v24 = vmul.f32 %v3758_v37, %v939_v41 }
 0x1af   : > { %v2720_v50 = vpop.eup %2719  ;;  %v1333_v16 = vadd.f32 %v1325_v61, %v1271_v19  ;;  %v1045_v29 = vmul.f32 1.442695, %v1035_v43  ;;  %v1239_v11 = vadd.f32 %v4924_v26, %v1221_v1  ;;  %v4149_v9 = vmul.f32 0.6931472, %v2718_v15 }
 0x1b0   : > { %v2722_v45 = vpop.eup %2721  ;;  %v1349_v58 = vmax.f32 %v4136_v6, %v4142_v32  ;;  %v1058_v48 = vmul.f32 %v2720_v50, %v4918_v35  ;;  %v1179_v3 = vmul.f32 1.442695, %v1169_v12  ;;  %v1301_v20 = vadd.f32 %v3979_v28, %v1283_v24 }
 0x1b1   : > { %v2724_v41 = vpop.eup %2723  ;;  %v4156_v56 = vmul.f32 %v1333_v16, %v4922_v39  ;;  %v1192_v61 = vmul.f32 %v2722_v45, %v4919_v60  ;;  %2737 = vpow2.f32 %v1045_v29  ;;  %v1249_v43 = vmul.f32 1.442695, %v1239_v11 }
 0x1b2   : > { %v2726_v26 = vpop.eup %2725  ;;  %v1066_v19 = vadd.f32 %v1058_v48, %v4028_v30  ;;  %v1262_v1 = vmul.f32 %v2724_v41, %v4920_v10  ;;  %2739 = vpow2.f32 %v1179_v3  ;;  %v1311_v15 = vmul.f32 1.442695, %v1301_v20 }
 0x1b3   : > { %v4162_v50 = vmax.f32 %v1349_v58, %v4156_v56  ;;  %v1200_v28 = vadd.f32 %v1192_v61, %v4034_v42  ;;  %v1324_v12 = vmul.f32 %v2726_v26, %v4921_v33  ;;  %2741 = vpow2.f32 %v1249_v43 }
 0x1b4   : > { %v4167_v24 = vmul.f32 %v4922_v39, %v1066_v19  ;;  %v1270_v16 = vadd.f32 %v1262_v1, %v3974_v27  ;;  %2743 = vpow2.f32 %v1311_v15  ;;  %v1030_v30 = vmul.f32 %v3772_v53, %v4149_v9  ;;  %v4925_v27 = vld [vmem:[#allocation58_spill] sm:$0xff] }
 0x1b5   : > { %v2728_v29 = vpop.eup %2727  ;;  %v1365_v3 = vsub.f32 %v4136_v6, %v4162_v50  ;;  %v1389_v11 = vsub.f32 %v4142_v32, %v4162_v50  ;;  %v1421_v42 = vsub.f32 %v4156_v56, %v4162_v50  ;;  %v4179_v45 = vmul.f32 %v1200_v28, %v4922_v39 }
 0x1b6   : > { %v2730_v58 = vpop.eup %2729  ;;  %v1332_v48 = vadd.f32 %v1324_v12, %v1270_v16  ;;  %v1038_v20 = vadd.f32 %v1030_v30, %v4925_v27  ;;  %v1164_v41 = vmul.f32 %v3782_v63, %v4149_v9  ;;  %v1224_v61 = vmul.f32 %v3743_v25, %v4149_v9 }
 0x1b7   : > { %v2732_v43 = vpop.eup %2731  ;;  %v1374_v26 = vmul.f32 1.442695, %v1365_v3  ;;  %v1398_v19 = vmul.f32 1.442695, %v1389_v11  ;;  %v1430_v1 = vmul.f32 1.442695, %v1421_v42  ;;  %v1348_v15 = vmax.f32 %v4167_v24, %v4179_v45 }
 0x1b8   : > { %v2734_v8 = vpop.eup %2733  ;;  %v4189_v28 = vmul.f32 %v1332_v48, %v4922_v39  ;;  %v1061_v12 = vmul.f32 %v2730_v58, %v4918_v35  ;;  %v1195_v16 = vmul.f32 %v2732_v43, %v4919_v60  ;;  %v1051_v30 = vmul.f32 1.442695, %v1038_v20  ;;  %v4926_v11 = vld [vmem:[#allocation59_spill] sm:$0xff] }
 0x1b9   : > { %v2736_v27 = vpop.eup %2735  ;;  %2745 = vpow2.f32 %v1374_v26  ;;  %v1265_v21 = vmul.f32 %v2734_v8, %v4920_v10  ;;  %v1172_v3 = vadd.f32 %v1164_v41, %v3982_v13  ;;  %v1242_v42 = vadd.f32 %v4926_v11, %v1224_v61 }
 0x1ba   : > { %2747 = vpow2.f32 %v1398_v19  ;;  %v4197_v22 = vmax.f32 %v1348_v15, %v4189_v28  ;;  %v1069_v48 = vadd.f32 %v1061_v12, %v4058_v36  ;;  %v1203_v38 = vadd.f32 %v1195_v16, %v4054_v40 }
 0x1bb   : > { %2749 = vpow2.f32 %v1430_v1  ;;  %v1273_v58 = vadd.f32 %v1265_v21, %v4031_v31  ;;  %v1327_v20 = vmul.f32 %v2736_v27, %v4921_v33  ;;  %v1185_v43 = vmul.f32 1.442695, %v1172_v3 }
 0x1bc   : > { %v1364_v8 = vsub.f32 %v4167_v24, %v4197_v22  ;;  %v1388_v13 = vsub.f32 %v4179_v45, %v4197_v22  ;;  %v1420_v41 = vsub.f32 %v4189_v28, %v4197_v22  ;;  %v4210_v61 = vmul.f32 %v4922_v39, %v1069_v48 }
 0x1bd   : > { %v4213_v40 = vmul.f32 %v1203_v38, %v4922_v39  ;;  %v1335_v36 = vadd.f32 %v1327_v20, %v1273_v58  ;;  %2751 = vpow2.f32 %v1051_v30  ;;  %v1255_v31 = vmul.f32 1.442695, %v1242_v42 }
 0x1be   : > { %v2738_v21 = vpop.eup %2737  ;;  %v1372_v26 = vmul.f32 1.442695, %v1364_v8  ;;  %v1396_v19 = vmul.f32 1.442695, %v1388_v13  ;;  %v1428_v1 = vmul.f32 1.442695, %v1420_v41  ;;  %2753 = vpow2.f32 %v1185_v43 }
 0x1bf   : > { %v2740_v15 = vpop.eup %2739  ;;  %v4216_v12 = vmul.f32 %v1335_v36, %v4922_v39  ;;  %v1351_v16 = vmax.f32 %v4210_v61, %v4213_v40  ;;  %v1060_v27 = vmul.f32 %v2738_v21, %v4918_v35  ;;  %2755 = vpow2.f32 %v1255_v31 }
 0x1c0   : > { %v2742_v38 = vpop.eup %2741  ;;  %2757 = vpow2.f32 %v1372_v26  ;;  %v1194_v30 = vmul.f32 %v2740_v15, %v4919_v60  ;;  %v1286_v3 = vmul.f32 %v3758_v37, %v4149_v9  ;;  %v943_v11 = vmul.f32 0.6931472, %v2728_v29 }
 0x1c1   : > { %v2744_v42 = vpop.eup %2743  ;;  %2759 = vpow2.f32 %v1396_v19  ;;  %v4225_v48 = vmax.f32 %v1351_v16, %v4216_v12  ;;  %v1068_v58 = vadd.f32 %v1060_v27, %v4071_v17  ;;  %v1264_v20 = vmul.f32 %v2742_v38, %v4920_v10  ;;  %v4927_v38 = vld [vmem:[#allocation60_spill] sm:$0xff] }
 0x1c2   : > { %2761 = vpow2.f32 %v1428_v1  ;;  %v1202_v43 = vadd.f32 %v1194_v30, %v4066_v46  ;;  %v1326_v8 = vmul.f32 %v2744_v42, %v4921_v33  ;;  %v1304_v13 = vadd.f32 %v3985_v34, %v1286_v3 }
 0x1c3   : > { %v1367_v9 = vsub.f32 %v4210_v61, %v4225_v48  ;;  %v1391_v29 = vsub.f32 %v4213_v40, %v4225_v48  ;;  %v1423_v41 = vsub.f32 %v4216_v12, %v4225_v48  ;;  %v4239_v17 = vmul.f32 %v4922_v39, %v1068_v58 }
 0x1c4   : > { %v4242_v36 = vmul.f32 %v1202_v43, %v4922_v39  ;;  %v1272_v46 = vadd.f32 %v1264_v20, %v4061_v7  ;;  %v1317_v31 = vmul.f32 1.442695, %v1304_v13  ;;  %v1029_v34 = vmul.f32 %v3772_v53, %v943_v11 }
 0x1c5   : > { %v1378_v21 = vmul.f32 1.442695, %v1367_v9  ;;  %v1402_v26 = vmul.f32 1.442695, %v1391_v29  ;;  %v1434_v19 = vmul.f32 1.442695, %v1423_v41  ;;  %v1163_v1 = vmul.f32 %v3782_v63, %v943_v11 }
 0x1c6   : > { %v2746_v15 = vpop.eup %2745  ;;  %v1334_v16 = vadd.f32 %v1326_v8, %v1272_v46  ;;  %v1350_v27 = vmax.f32 %v4239_v17, %v4242_v36  ;;  %2763 = vpow2.f32 %v1317_v31  ;;  %v1037_v30 = vadd.f32 %v1029_v34, %v4927_v38 }
 0x1c7   : > { %v2748_v3 = vpop.eup %2747  ;;  %2765 = vpow2.f32 %v1378_v21  ;;  %v1171_v7 = vadd.f32 %v1163_v1, %v3988_v5  ;;  %v1223_v42 = vmul.f32 %v3743_v25, %v943_v11  ;;  %v1285_v58 = vmul.f32 %v3758_v37, %v943_v11 }
 0x1c8   : > { %v2750_v20 = vpop.eup %2749  ;;  %v1413_v43 = vadd.f32 %v2748_v3, %v2746_v15  ;;  %2767 = vpow2.f32 %v1402_v26  ;;  %v4254_v13 = vmul.f32 %v1334_v16, %v4922_v39  ;;  %v1049_v8 = vmul.f32 1.442695, %v1037_v30 }
 0x1c9   : > { %2769 = vpow2.f32 %v1434_v19  ;;  %v1183_v9 = vmul.f32 1.442695, %v1171_v7  ;;  %v1241_v29 = vadd.f32 %v3925_v55, %v1223_v42  ;;  %v1303_v41 = vadd.f32 %v3991_v18, %v1285_v58 }
 0x1ca   : > { %v2752_v46 = vpop.eup %2751  ;;  %v1445_v31 = vadd.f32 %v2750_v20, %v1413_v43  ;;  %v4259_v5 = vmax.f32 %v1350_v27, %v4254_v13  ;;  %2771 = vpow2.f32 %v1049_v8  ;;  %v4928_v11 = vmax.f32 %v4118_v59, 2.7182817 }
 0x1cb   : > { %v2754_v21 = vpop.eup %2753  ;;  %v1063_v26 = vmul.f32 %v2752_v46, %v4918_v35  ;;  %2773 = vpow2.f32 %v1183_v9  ;;  %v1253_v19 = vmul.f32 1.442695, %v1241_v29  ;;  %v1315_v1 = vmul.f32 1.442695, %v1303_v41  ;;  %v4929_v9 = vld [vmem:[#allocation39_spill] sm:$0xff] }
 0x1cc   : > { %v923_v34 = vmul.f32 %v3724_v4, %v4928_v11  ;;  %v2756_v15 = vpop.eup %2755  ;;  %2775 = vlog2.f32 %v1445_v31  ;;  %v1366_v55 = vsub.f32 %v4239_v17, %v4259_v5  ;;  %v1390_v18 = vsub.f32 %v4242_v36, %v4259_v5 }
 0x1cd   : > { %v1422_v16 = vsub.f32 %v4254_v13, %v4259_v5  ;;  %v2758_v59 = vpop.eup %2757  ;;  %v1071_v27 = vadd.f32 %v1063_v26, %v4091_v52  ;;  %v1197_v38 = vmul.f32 %v2754_v21, %v4919_v60  ;;  %v1267_v30 = vmul.f32 %v2756_v15, %v4920_v10 }
 0x1ce   : > { %2777 = vpow2.f32 %v1253_v19  ;;  %v2760_v3 = vpop.eup %2759  ;;  %v1376_v7 = vmul.f32 1.442695, %v1366_v55  ;;  %v1400_v42 = vmul.f32 1.442695, %v1390_v18  ;;  %v4277_v29 = vadd.f32 %v4127_v47, %v4929_v9 }
 0x1cf   : > { %v1432_v58 = vmul.f32 1.442695, %v1422_v16  ;;  %2779 = vpow2.f32 %v1315_v1  ;;  %v2762_v20 = vpop.eup %2761  ;;  %v1412_v43 = vadd.f32 %v2760_v3, %v2758_v59  ;;  %v1205_v8 = vadd.f32 %v1197_v38, %v4087_v44  ;;  %v4932_v59 = vld [vmem:[#allocation37_spill] sm:$0xff] }
 0x1d0   : > { %2781 = vpow2.f32 %v1376_v7  ;;  %v4930_v52 = vsub.f32 %v4122_v49, %v3709_v57  ;;  %v4283_v31 = vmul.f32 %v4922_v39, %v1071_v27  ;;  %v4286_v11 = vadd.f32 %v3735_v14, %v923_v34 }
 0x1d1   : > { %v1444_v46 = vadd.f32 %v2762_v20, %v1412_v43  ;;  %2783 = vpow2.f32 %v1400_v42  ;;  %v4290_v44 = vmul.f32 %v1205_v8, %v4922_v39  ;;  %v1275_v47 = vadd.f32 %v1267_v30, %v4084_v23  ;;  %v4933_v42 = vld [vmem:[#allocation53_spill] sm:$0xff] }
 0x1d2   : > { %v904_v41 = vadd.f32 2.7182817, %v4930_v52  ;;  %2785 = vpow2.f32 %v1432_v58  ;;  %v1500_v57 = vlaneseq  ;;  %v1000_v49 = vmul.f32 %v4048_v0, %v3777_v62 }
 0x1d3   : > { %v2764_v26 = vpop.eup %2763  ;;  %2787 = vlog2.f32 %v1444_v46  ;;  %v1134_v55 = vmul.f32 %v4063_v54, %v3705_v51  ;;  %v1353_v62 = vmax.f32 %v4283_v31, %v4290_v44 }
 0x1d4   : > { %v912_v21 = vmax.f32 %v904_v41, 2.7182817  ;;  %v2766_v19 = vpop.eup %2765  ;;  %v1329_v1 = vmul.f32 %v2764_v26, %v4921_v33  ;;  %2789 = vlog2.f32 %v4286_v11  ;;  %v4308_v0 = vand.u32 127, %v1500_v57 }
 0x1d5   : > { %v2768_v15 = vpop.eup %2767  ;;  %v1008_v51 = vadd.f32 %v1000_v49, %v4932_v59  ;;  %v1142_v58 = vadd.f32 %v1134_v55, %v4933_v42 }
 0x1d6   : > { %v922_v34 = vmul.f32 %v3724_v4, %v912_v21  ;;  %v2770_v23 = vpop.eup %2769  ;;  %v1415_v18 = vadd.f32 %v2768_v15, %v2766_v19  ;;  %v1337_v16 = vadd.f32 %v1329_v1, %v1275_v47  ;;  %vm1502_vm0 = vcmp.eq.s32.totalorder %v4308_v0, 0 }
 0x1d7   : > { %v2772_v4 = vpop.eup %2771  ;;  %vm1511_vm2 = vcmp.eq.s32.totalorder %v4308_v0, 1  ;;  %vm1520_vm3 = vcmp.eq.s32.totalorder %v4308_v0, 2 }
 0x1d8   : > { %v2774_v54 = vpop.eup %2773  ;;  %v1447_v27 = vadd.f32 %v2770_v23, %v1415_v18  ;;  %v4312_v38 = vmul.f32 %v1337_v16, %v4922_v39  ;;  %v1062_v30 = vmul.f32 %v2772_v4, %v4918_v35  ;;  %v4316_v3 = vadd.f32 %v3735_v14, %v922_v34 }
 0x1d9   : > { %v2776_v7 = vpop.eup %2775  ;;  %v1196_v20 = vmul.f32 %v2774_v54, %v4919_v60 }
 0x1da   : > { %v1455_v8 = vmul.f32 0.6931472, %v2776_v7  ;;  %2791 = vlog2.f32 %v1447_v27  ;;  %v4327_v9 = vmax.f32 %v1353_v62, %v4312_v38  ;;  %v1070_v52 = vadd.f32 %v1062_v30, %v1008_v51 }
 0x1db   : > { %v2778_v43 = vpop.eup %2777  ;;  %v1204_v14 = vadd.f32 %v1196_v20, %v1142_v58  ;;  %2793 = vlog2.f32 %v4316_v3 }
 0x1dc   : > { %v2780_v41 = vpop.eup %2779  ;;  %v1266_v46 = vmul.f32 %v2778_v43, %v4920_v10  ;;  %v1469_v47 = vadd.f32 %v1455_v8, %v4162_v50  ;;  %v1369_v21 = vsub.f32 %v4283_v31, %v4327_v9  ;;  %v1393_v57 = vsub.f32 %v4290_v44, %v4327_v9 }
 0x1dd   : > { %v2782_v26 = vpop.eup %2781  ;;  %v4340_v49 = vmul.f32 %v4922_v39, %v1070_v52  ;;  %v1328_v1 = vmul.f32 %v2780_v41, %v4921_v33  ;;  %v4347_v23 = vmul.f32 %v1204_v14, %v4922_v39  ;;  %v1425_v62 = vsub.f32 %v4312_v38, %v4327_v9 }
 0x1de   : > { %v1274_v19 = vadd.f32 %v1266_v46, %v4110_v2  ;;  %v2784_v34 = vpop.eup %2783  ;;  %v1477_v50 = vsub.f32 %v4136_v6, %v1469_v47  ;;  %v1485_v15 = vsub.f32 %v4142_v32, %v1469_v47  ;;  %v1382_v55 = vmul.f32 1.442695, %v1369_v21 }
 0x1df   : > { %v2786_v18 = vpop.eup %2785  ;;  %v1414_v16 = vadd.f32 %v2784_v34, %v2782_v26  ;;  %v1493_v6 = vsub.f32 %v4156_v56, %v1469_v47  ;;  %v1406_v7 = vmul.f32 1.442695, %v1393_v57  ;;  %v1352_v56 = vmax.f32 %v4340_v49, %v4347_v23 }
 0x1e0   : > { %v1336_v4 = vadd.f32 %v1328_v1, %v1274_v19  ;;  %v2788_v2 = vpop.eup %2787  ;;  %v1504_v32 = vsel %vm1502_vm0, %v1477_v50, 0.0  ;;  %v1540_v59 = vmul.f32 1.442695, %v1477_v50  ;;  %v1654_v51 = vmul.f32 1.442695, %v1485_v15 }
 0x1e1   : > { %v1513_v54 = vsel %vm1511_vm2, %v1485_v15, %v1504_v32  ;;  %v1453_v27 = vmul.f32 0.6931472, %v2788_v2  ;;  %v1446_v30 = vadd.f32 %v2786_v18, %v1414_v16  ;;  %2795 = vpow2.f32 %v1382_v55  ;;  %v2790_v20 = vpop.eup %2789 }
 0x1e2   : > { %v1522_v42 = vsel %vm1520_vm3, %v1493_v6, %v1513_v54  ;;  %v4365_v58 = vmul.f32 %v1336_v4, %v4922_v39  ;;  %2797 = vpow2.f32 %v1540_v59  ;;  %v1766_v8 = vmul.f32 1.442695, %v1493_v6 }
 0x1e3   : > { %1531 = vst.msk [vmem:[%s4355_s14 + $0x8] sm:$0xff] %vm1529_vm1, %v1522_v42  ;;  %v1468_v43 = vadd.f32 %v1453_v27, %v4197_v22  ;;  %2799 = vpow2.f32 %v1654_v51  ;;  %v1438_v52 = vmul.f32 1.442695, %v1425_v62  ;;  %v949_v26 = vmul.f32 0.6931472, %v2790_v20 }
 0x1e4   : > { %v4373_v41 = vmax.f32 %v1352_v56, %v4365_v58  ;;  %2801 = vlog2.f32 %v1446_v30  ;;  %v4936_v56 = vld [vmem:[#allocation55_spill] sm:$0xff] }
 0x1e5   : > { %v1476_v14 = vsub.f32 %v4167_v24, %v1468_v43  ;;  %v1484_v46 = vsub.f32 %v4179_v45, %v1468_v43  ;;  %v1492_v47 = vsub.f32 %v4189_v28, %v1468_v43  ;;  %2803 = vpow2.f32 %v1406_v7  ;;  %v4935_v7 = vld [vmem:[#allocation61_spill] sm:$0xff] }
 0x1e6   : > { %v1368_v21 = vsub.f32 %v4340_v49, %v4373_v41  ;;  %v1392_v22 = vsub.f32 %v4347_v23, %v4373_v41  ;;  %v1424_v45 = vsub.f32 %v4365_v58, %v4373_v41  ;;  %2805 = vpow2.f32 %v1438_v52 }
 0x1e7   : > { %v2792_v57 = vpop.eup %2791  ;;  %v1503_v19 = vsel %vm1502_vm0, %v1476_v14, 0.0  ;;  %v1538_v1 = vmul.f32 1.442695, %v1476_v14  ;;  %v1652_v24 = vmul.f32 1.442695, %v1484_v46  ;;  %2807 = vpow2.f32 %v1766_v8 }
 0x1e8   : > { %v1512_v28 = vsel %vm1511_vm2, %v1484_v46, %v1503_v19  ;;  %v1459_v34 = vmul.f32 0.6931472, %v2792_v57  ;;  %v1380_v50 = vmul.f32 1.442695, %v1368_v21  ;;  %v2794_v15 = vpop.eup %2793  ;;  %v1764_v18 = vmul.f32 1.442695, %v1492_v47 }
 0x1e9   : > { %v1521_v55 = vsel %vm1520_vm3, %v1492_v47, %v1512_v28  ;;  %v1404_v16 = vmul.f32 1.442695, %v1392_v22  ;;  %2809 = vpow2.f32 %v1652_v24  ;;  %v1032_v4 = vmul.f32 %v3772_v53, %v949_v26 }
 0x1ea   : > { %1530 = vst.msk [vmem:[%s4355_s14] sm:$0xff] %vm1529_vm1, %v1521_v55  ;;  %v1471_v62 = vadd.f32 %v1459_v34, %v4225_v48  ;;  %v1166_v2 = vmul.f32 %v3782_v63, %v949_v26  ;;  %2811 = vpow2.f32 %v1538_v1  ;;  %v1436_v6 = vmul.f32 1.442695, %v1424_v45  ;;  %v4934_v48 = vld [vmem:[#allocation54_spill] sm:$0xff] }
 0x1eb   : > { %v1226_v32 = vmul.f32 %v3743_v25, %v949_v26  ;;  %v1288_v59 = vmul.f32 %v3758_v37, %v949_v26  ;;  %2813 = vpow2.f32 %v1380_v50  ;;  %v947_v27 = vmul.f32 0.6931472, %v2794_v15  ;;  %v4937_v26 = vld [vmem:[#allocation62_spill] sm:$0xff] }
 0x1ec   : > { %v1479_v51 = vsub.f32 %v4210_v61, %v1471_v62  ;;  %v1487_v54 = vsub.f32 %v4213_v40, %v1471_v62  ;;  %2815 = vpow2.f32 %v1404_v16  ;;  %v1040_v30 = vadd.f32 %v1032_v4, %v4934_v48  ;;  %v4938_v16 = vld [vmem:[#allocation56_spill] sm:$0xff]  ;;  %v4939_v4 = vld [vmem:[#allocation63_spill] sm:$0xff] }
 0x1ed   : > { %v1174_v42 = vadd.f32 %v1166_v2, %v4935_v7  ;;  %v1244_v20 = vadd.f32 %v4936_v56, %v1226_v32  ;;  %v4405_v43 = vsub.f32 %v4216_v12, %v1471_v62  ;;  %2817 = vpow2.f32 %v1436_v6 }
 0x1ee   : > { %v1506_v61 = vsel %vm1502_vm0, %v1479_v51, 0.0  ;;  %v1544_v8 = vmul.f32 1.442695, %v1479_v51  ;;  %v1658_v40 = vmul.f32 1.442695, %v1487_v54  ;;  %v2796_v52 = vpop.eup %2795  ;;  %v1306_v57 = vadd.f32 %v4937_v26, %v1288_v59 }
 0x1ef   : > { %v1515_v14 = vsel %vm1511_vm2, %v1487_v54, %v1506_v61  ;;  %v1055_v46 = vmul.f32 1.442695, %v1040_v30  ;;  %v1189_v47 = vmul.f32 1.442695, %v1174_v42  ;;  %v4411_v21 = vpop.eup %2797  ;;  %v1259_v12 = vmul.f32 1.442695, %v1244_v20 }
 0x1f0   : > { %v1524_v22 = vsel %vm1520_vm3, %v4405_v43, %v1515_v14  ;;  %2819 = vpow2.f32 %v1544_v8  ;;  %v2800_v19 = vpop.eup %2799  ;;  %v1031_v1 = vmul.f32 %v3772_v53, %v947_v27  ;;  %v1165_v24 = vmul.f32 %v3782_v63, %v947_v27  ;;  %v4940_v63 = vld [vmem:[#allocation57_spill] sm:$0xff] }
 0x1f1   : > { %1533 = vst.msk [vmem:[%s4355_s14 + $0x18] sm:$0xff] %vm1529_vm1, %v1524_v22  ;;  %2821 = vpow2.f32 %v1658_v40  ;;  %v1225_v45 = vmul.f32 %v3743_v25, %v947_v27  ;;  %v2802_v28 = vpop.eup %2801  ;;  %v1321_v34 = vmul.f32 1.442695, %v1306_v57  ;;  %v1287_v50 = vmul.f32 %v3758_v37, %v947_v27  ;;  %v4941_v25 = vld [vmem:[#allocation64_spill] sm:$0xff] }
 0x1f2   : > { %2823 = vpow2.f32 %v1764_v18  ;;  %v2804_v15 = vpop.eup %2803  ;;  %v1457_v55 = vmul.f32 0.6931472, %v2802_v28  ;;  %v1039_v62 = vadd.f32 %v1031_v1, %v4938_v16  ;;  %v1173_v2 = vadd.f32 %v1165_v24, %v4939_v4  ;;  %v4451_v28 = vld [vmem:[%s3593_s9] sm:$0xff]  }
 0x1f3   : > { %2825 = vpow2.f32 %v1055_v46  ;;  %v1417_v53 = vadd.f32 %v2804_v15, %v2796_v52  ;;  %v1243_v6 = vadd.f32 %v4940_v63, %v1225_v45  ;;  %v1305_v32 = vadd.f32 %v4941_v25, %v1287_v50  ;;  %v2806_v59 = vpop.eup %2805 }
 0x1f4   : > { %2827 = vpow2.f32 %v1189_v47  ;;  %v1470_v18 = vadd.f32 %v1457_v55, %v4259_v5  ;;  %v1053_v51 = vmul.f32 1.442695, %v1039_v62  ;;  %v2808_v54 = vpop.eup %2807  ;;  %v4431_v37 = vstv %s4399_s2 }
 0x1f5   : > { %2829 = vpow2.f32 %v1259_v12  ;;  %v1449_v27 = vadd.f32 %v2806_v59, %v1417_v53  ;;  %v1187_v48 = vmul.f32 1.442695, %v1173_v2  ;;  %v1257_v5 = vmul.f32 1.442695, %v1243_v6  ;;  %v4468_v59 = vld [vmem:[%s3583_s20] sm:$0xff]  }
 0x1f6   : > { %2831 = vpow2.f32 %v1321_v34  ;;  %v2810_v30 = vpop.eup %2809  ;;  %v1478_v7 = vsub.f32 %v4239_v17, %v1470_v18  ;;  %v1486_v42 = vsub.f32 %v4242_v36, %v1470_v18  ;;  %v1494_v56 = vsub.f32 %v4254_v13, %v1470_v18 }
 0x1f7   : > { %2833 = vpow2.f32 %v1053_v51  ;;  %v2812_v20 = vpop.eup %2811  ;;  %v4439_v14 = vstv %s4422_s27  ;;  %v1668_v13 = vmul.f32 %v2810_v30, %v4431_v37  ;;  %v1669_v12 = vmul.f32 %v2800_v19, %v4431_v37  ;;  %v4942_v30 = vld [vmem:[#allocation47_spill] sm:$0xff]  ;;  %s4948_s27 = sld [smem:[#allocation71_spill]] }
 0x1f8   : > { %2835 = vlog2.f32 %v1449_v27  ;;  %v2814_v61 = vpop.eup %2813  ;;  %v1505_v8 = vsel %vm1502_vm0, %v1478_v7, 0.0  ;;  %v1542_v40 = vmul.f32 1.442695, %v1478_v7  ;;  %v1656_v52 = vmul.f32 1.442695, %v1486_v42 }
 0x1f9   : > { %v2816_v46 = vpop.eup %2815  ;;  %v1514_v17 = vsel %vm1511_vm2, %v1486_v42, %v1505_v8  ;;  %v1768_v36 = vmul.f32 1.442695, %v1494_v56  ;;  %2837 = vpow2.f32 %v1187_v48  ;;  %v1319_v57 = vmul.f32 1.442695, %v1305_v32 }
 0x1fa   : > { %v1523_v47 = vsel %vm1520_vm3, %v1494_v56, %v1514_v17  ;;  %2839 = vpow2.f32 %v1542_v40  ;;  %v1416_v22 = vadd.f32 %v2816_v46, %v2814_v61  ;;  %v2818_v26 = vpop.eup %2817  ;;  %v1770_v24 = vmul.f32 1.442695, %v4405_v43 }
 0x1fb   : > { %1532 = vst.msk [vmem:[%s4355_s14 + $0x10] sm:$0xff] %vm1529_vm1, %v1523_v47  ;;  %2841 = vpow2.f32 %v1656_v52  ;;  %v1676_v50 = vsub.f32 %v1668_v13, %v4439_v14  ;;  %v1555_v15 = vmul.f32 %v2812_v20, %v4431_v37  ;;  %v1677_v16 = vsub.f32 %v1669_v12, %v4439_v14  ;;  %v4943_v20 = vld [vmem:[#allocation50_spill] sm:$0xff] }
 0x1fc   : > { %2843 = vpow2.f32 %v1768_v36  ;;  %v1448_v45 = vadd.f32 %v2818_v26, %v1416_v22  ;;  %v1556_v43 = vmul.f32 %v4411_v21, %v4431_v37  ;;  %v2409_v4 = vunpack.c.l.bf16 %v4451_v28 }
 0x1fd   : > { %v2820_v1 = vpop.eup %2819  ;;  %2845 = vpow2.f32 %v1257_v5  ;;  %v2410_v2 = vunpack.c.h.bf16 %v4451_v28  ;;  %v4463_v6 = vmul.f32 %v2808_v54, %v4431_v37  ;;  %v1564_v27 = vsub.f32 %v1555_v15, %v4439_v14  ;;  %s4686_s29 = scalar_lea.hbm %s4948_s27, %s2320_s11 }
 0x1fe   : > { %v2822_v34 = vpop.eup %2821  ;;  %2847 = vlog2.f32 %v1448_v45  ;;  %v1558_v53 = vmul.f32 %v2820_v1, %v4431_v37  ;;  %v1565_v42 = vsub.f32 %v1556_v43, %v4439_v14  ;;  %v2373_v8 = vunpack.c.l.bf16 %v4468_v59 }
 0x1ff   : > { %v2824_v19 = vpop.eup %2823  ;;  %v1671_v55 = vmul.f32 %v2822_v34, %v4431_v37  ;;  %2849 = vpow2.f32 %v1319_v57  ;;  %v2374_v22 = vunpack.c.h.bf16 %v4468_v59 }
 0x200   : > { %v2826_v62 = vpop.eup %2825  ;;  %2851 = vpow2.f32 %v1770_v24  ;;  %v1780_v18 = vmul.f32 %v2824_v19, %v4431_v37  ;;  %v1567_v61 = vsub.f32 %v1558_v53, %v4439_v14 }
 0x201   : > { %v2828_v63 = vpop.eup %2827  ;;  %v1065_v25 = vmul.f32 %v2826_v62, %v4918_v35  ;;  %v1679_v32 = vsub.f32 %v1671_v55, %v4439_v14  ;;  %2853 = vtanh.f32 %v1676_v50 }
 0x202   : > { %v2830_v21 = vpop.eup %2829  ;;  %v1199_v51 = vmul.f32 %v2828_v63, %v4919_v60  ;;  %2855 = vtanh.f32 %v1677_v16  ;;  %v1788_v1 = vsub.f32 %v1780_v18, %v4439_v14 }
 0x203   : > { %v2832_v48 = vpop.eup %2831  ;;  %v1073_v7 = vadd.f32 %v1065_v25, %v4942_v30  ;;  %v1269_v54 = vmul.f32 %v2830_v21, %v4920_v10  ;;  %2857 = vtanh.f32 %v1679_v32 }
 0x204   : > { %v2834_v56 = vpop.eup %2833  ;;  %v1207_v5 = vadd.f32 %v1199_v51, %v4943_v20  ;;  %v1331_v17 = vmul.f32 %v2832_v48, %v4921_v33  ;;  %2859 = vtanh.f32 %v1564_v27 }
 0x205   : > { %v2836_v40 = vpop.eup %2835  ;;  %v4480_v52 = vmul.f32 %v4922_v39, %v1073_v7  ;;  %v1277_v46 = vadd.f32 %v1269_v54, %v4286_v11  ;;  %v1064_v36 = vmul.f32 %v2834_v56, %v4918_v35  ;;  %2861 = vtanh.f32 %v1565_v42 }
 0x206   : > { %v1463_v13 = vmul.f32 0.6931472, %v2836_v40  ;;  %v4486_v47 = vmul.f32 %v1207_v5, %v4922_v39  ;;  %v2838_v12 = vpop.eup %2837  ;;  %2863 = vtanh.f32 %v1567_v61 }
 0x207   : > { %v1339_v26 = vadd.f32 %v1331_v17, %v1277_v46  ;;  %v1072_v57 = vadd.f32 %v1064_v36, %v4277_v29  ;;  %v2840_v24 = vpop.eup %2839  ;;  %v1198_v45 = vmul.f32 %v2838_v12, %v4919_v60  ;;  %2865 = vtanh.f32 %v1788_v1  ;;  %v4944_v60 = vld [vmem:[#allocation35_spill] sm:$0xff] }
 0x208   : > { %v1473_v11 = vadd.f32 %v1463_v13, %v4327_v9  ;;  %v1355_v35 = vmax.f32 %v4480_v52, %v4486_v47  ;;  %v2842_v34 = vpop.eup %2841  ;;  %v4502_v29 = vmul.f32 %v2840_v24, %v4431_v37 }
 0x209   : > { %v4496_v50 = vmul.f32 %v1339_v26, %v4922_v39  ;;  %v4499_v15 = vmul.f32 %v4922_v39, %v1072_v57  ;;  %v2844_v19 = vpop.eup %2843  ;;  %v1206_v43 = vadd.f32 %v1198_v45, %v4944_v60  ;;  %v1670_v25 = vmul.f32 %v2842_v34, %v4431_v37 }
 0x20a   : > { %v1481_v9 = vsub.f32 %v4283_v31, %v1473_v11  ;;  %v1489_v55 = vsub.f32 %v4290_v44, %v1473_v11  ;;  %v1497_v16 = vsub.f32 %v4312_v38, %v1473_v11  ;;  %v2846_v62 = vpop.eup %2845  ;;  %v4509_v53 = vmul.f32 %v2844_v19, %v4431_v37 }
 0x20b   : > { %v4512_v63 = vmax.f32 %v1355_v35, %v4496_v50  ;;  %v1566_v32 = vsub.f32 %v4502_v29, %v4439_v14  ;;  %v2848_v21 = vpop.eup %2847  ;;  %v4520_v18 = vmul.f32 %v1206_v43, %v4922_v39  ;;  %v1268_v46 = vmul.f32 %v2846_v62, %v4920_v10 }
 0x20c   : > { %v1508_v31 = vsel %vm1502_vm0, %v1481_v9, 0.0  ;;  %v1548_v44 = vmul.f32 1.442695, %v1481_v9  ;;  %v1662_v38 = vmul.f32 1.442695, %v1489_v55  ;;  %v2850_v51 = vpop.eup %2849  ;;  %v1678_v11 = vsub.f32 %v1670_v25, %v4439_v14 }
 0x20d   : > { %v1517_v27 = vsel %vm1511_vm2, %v1489_v55, %v1508_v31  ;;  %v1774_v48 = vmul.f32 1.442695, %v1497_v16  ;;  %v1461_v30 = vmul.f32 0.6931472, %v2848_v21  ;;  %v1371_v7 = vsub.f32 %v4480_v52, %v4512_v63  ;;  %v2852_v54 = vpop.eup %2851 }
 0x20e   : > { %v1526_v42 = vsel %vm1520_vm3, %v1497_v16, %v1517_v27  ;;  %2867 = vpow2.f32 %v1548_v44  ;;  %v1395_v56 = vsub.f32 %v4486_v47, %v4512_v63  ;;  %v1427_v20 = vsub.f32 %v4496_v50, %v4512_v63  ;;  %v2854_v5 = vpop.eup %2853 }
 0x20f   : > { %1535 = vst.msk [vmem:[%s4355_s14 + $0x28] sm:$0xff] %vm1529_vm1, %v1526_v42  ;;  %2869 = vpow2.f32 %v1662_v38  ;;  %v1472_v61 = vadd.f32 %v1461_v30, %v4373_v41  ;;  %v1386_v40 = vmul.f32 1.442695, %v1371_v7  ;;  %v2856_v17 = vpop.eup %2855  ;;  %v1330_v12 = vmul.f32 %v2850_v51, %v4921_v33 }
 0x210   : > { %2871 = vpow2.f32 %v1774_v48  ;;  %v1410_v36 = vmul.f32 1.442695, %v1395_v56  ;;  %v1442_v13 = vmul.f32 1.442695, %v1427_v20  ;;  %v4537_v26 = vpop.eup %2857  ;;  %v1276_v41 = vadd.f32 %v1268_v46, %v4316_v3  ;;  %v2488_v46 = vld [vmem:[%s3583_s20 + $0x8] sm:$0xff]  }
 0x211   : > { %v1480_v57 = vsub.f32 %v4340_v49, %v1472_v61  ;;  %v1488_v1 = vsub.f32 %v4347_v23, %v1472_v61  ;;  %v1496_v24 = vsub.f32 %v4365_v58, %v1472_v61  ;;  %2873 = vpow2.f32 %v1386_v40  ;;  %v2860_v35 = vpop.eup %2859 }
 0x212   : > { %2875 = vpow2.f32 %v1410_v36  ;;  %v1354_v10 = vmax.f32 %v4499_v15, %v4520_v18  ;;  %v2862_v23 = vpop.eup %2861  ;;  %v1338_v29 = vadd.f32 %v1330_v12, %v1276_v41  ;;  %v1692_v9 = vmax.f32 %v2854_v5, 0.0 }
 0x213   : > { %v1507_v33 = vsel %vm1502_vm0, %v1480_v57, 0.0  ;;  %v1546_v45 = vmul.f32 1.442695, %v1480_v57  ;;  %v1660_v49 = vmul.f32 1.442695, %v1488_v1  ;;  %2877 = vpow2.f32 %v1442_v13  ;;  %v4550_v3 = vpop.eup %2863 }
 0x214   : > { %v1516_v58 = vsel %vm1511_vm2, %v1488_v1, %v1507_v33  ;;  %v1772_v34 = vmul.f32 1.442695, %v1496_v24  ;;  %2879 = vtanh.f32 %v1678_v11  ;;  %v1693_v55 = vmax.f32 %v2856_v17, 0.0  ;;  %v4554_v16 = vpop.eup %2865 }
 0x215   : > { %v1525_v19 = vsel %vm1520_vm3, %v1496_v24, %v1516_v58  ;;  %2881 = vpow2.f32 %v1546_v45  ;;  %v4559_v60 = vmul.f32 %v1338_v29, %v4922_v39  ;;  %v1580_v43 = vmax.f32 %v2860_v35, 0.0 }
 0x216   : > { %1534 = vst.msk [vmem:[%s4355_s14 + $0x20] sm:$0xff] %vm1529_vm1, %v1525_v19  ;;  %2883 = vpow2.f32 %v1660_v49  ;;  %v1789_v62 = vsub.f32 %v4463_v6, %v4439_v14  ;;  %v1716_v25 = vmul.f32 %v2409_v4, %v1692_v9  ;;  %v1717_v21 = vmul.f32 %v2410_v2, %v1693_v55  ;;  %v2444_v49 = vld [vmem:[%s3600_s26] sm:$0xff]  }
 0x217   : > { %2885 = vpow2.f32 %v1772_v34  ;;  %v1581_v31 = vmax.f32 %v2862_v23, 0.0  ;;  %v4568_v44 = vmax.f32 %v1354_v10, %v4559_v60  ;;  %v1604_v38 = vmul.f32 %v2373_v8, %v1580_v43 }
 0x218   : > { %2887 = vtanh.f32 %v1566_v32  ;;  %v2426_v39 = vpack.c.bf16 %v1717_v21, %v1716_v25  ;;  %v1790_v51 = vsub.f32 %v4509_v53, %v4439_v14  ;;  %v2494_v32 = vld [vmem:[%s3593_s9 + $0x8] sm:$0xff]   ;;  %v1783_v8 = vmul.f32 %v2852_v54, %v4431_v37 }
 0x219   : > { %v1605_v6 = vmul.f32 %v2374_v22, %v1581_v31  ;;  %v1370_v4 = vsub.f32 %v4499_v15, %v4568_v44  ;;  %v1394_v28 = vsub.f32 %v4520_v18, %v4568_v44  ;;  %v1426_v2 = vsub.f32 %v4559_v60, %v4568_v44 }
 0x21a   : > { %2427 = vst [vmem:[%s4585_s18] sm:$0xff] %v2426_v39   ;;  %2889 = vtanh.f32 %v1789_v62  ;;  %v1695_v20 = vmax.f32 %v4537_v26, 0.0  ;;  %v2414_v5 = vunpack.c.h.bf16 %v2494_v32  ;;  %v1791_v13 = vsub.f32 %v1783_v8, %v4439_v14 }
 0x21b   : > { %v2868_v27 = vpop.eup %2867  ;;  %v2390_v59 = vpack.c.bf16 %v1605_v6, %v1604_v38  ;;  %v1384_v53 = vmul.f32 1.442695, %v1370_v4  ;;  %v1408_v48 = vmul.f32 1.442695, %v1394_v28  ;;  %v1440_v30 = vmul.f32 1.442695, %v1426_v2 }
 0x21c   : > { %v2870_v22 = vpop.eup %2869  ;;  %v1560_v7 = vmul.f32 %v2868_v27, %v4431_v37  ;;  %2891 = vtanh.f32 %v1790_v51  ;;  %v2413_v57 = vunpack.c.l.bf16 %v2494_v32  ;;  %v1719_v24 = vmul.f32 %v2414_v5, %v1695_v20  ;;  %v2500_v2 = vld [vmem:[%s3600_s26 + $0x8] sm:$0xff]   ;;  %v2489_v20 = vld [vmem:[%s3583_s20 + $0x10] sm:$0xff]  }
 0x21d   : > { %v2872_v42 = vpop.eup %2871  ;;  %v1673_v56 = vmul.f32 %v2870_v22, %v4431_v37  ;;  %2391 = vst [vmem:[%s4592_s30] sm:$0xff] %v2390_v59   ;;  %2893 = vpow2.f32 %v1384_v53  ;;  %v2378_v41 = vunpack.c.h.bf16 %v2488_v46  ;;  %v1583_v45 = vmax.f32 %v4550_v3, 0.0 }
 0x21e   : > { %v2874_v54 = vpop.eup %2873  ;;  %v1785_v61 = vmul.f32 %v2872_v42, %v4431_v37  ;;  %v1569_v40 = vsub.f32 %v1560_v7, %v4439_v14  ;;  %2895 = vpow2.f32 %v1408_v48  ;;  %v2377_v34 = vunpack.c.l.bf16 %v2488_v46 }
 0x21f   : > { %v2876_v17 = vpop.eup %2875  ;;  %v1681_v36 = vsub.f32 %v1673_v56, %v4439_v14  ;;  %2897 = vpow2.f32 %v1440_v30  ;;  %v1804_v55 = vmax.f32 %v4554_v16, 0.0  ;;  %v2445_v3 = vunpack.c.l.bf16 %v2444_v49  ;;  %v2495_v56 = vld [vmem:[%s3593_s9 + $0x10] sm:$0xff]  }
 0x220   : > { %v2878_v12 = vpop.eup %2877  ;;  %v1419_v26 = vadd.f32 %v2876_v17, %v2874_v54  ;;  %v1793_v10 = vsub.f32 %v1785_v61, %v4439_v14  ;;  %v1607_v38 = vmul.f32 %v2378_v41, %v1583_v45  ;;  %v2446_v51 = vunpack.c.h.bf16 %v2444_v49 }
 0x221   : > { %v2880_v1 = vpop.eup %2879  ;;  %2899 = vtanh.f32 %v1681_v36  ;;  %v1828_v32 = vmul.f32 %v2445_v3, %v1804_v55  ;;  %v2449_v30 = vunpack.c.l.bf16 %v2500_v2  ;;  %v2450_v46 = vunpack.c.h.bf16 %v2500_v2 }
 0x222   : > { %v2882_v11 = vpop.eup %2881  ;;  %v1451_v35 = vadd.f32 %v2878_v12, %v1419_v26  ;;  %v1694_v33 = vmax.f32 %v2880_v1, 0.0  ;;  %2901 = vtanh.f32 %v1569_v40  ;;  %v2418_v36 = vunpack.c.h.bf16 %v2495_v56  ;;  %v2501_v12 = vld [vmem:[%s3600_s26 + $0x10] sm:$0xff]  }
 0x223   : > { %v2884_v23 = vpop.eup %2883  ;;  %v1559_v58 = vmul.f32 %v2882_v11, %v4431_v37  ;;  %2903 = vtanh.f32 %v1791_v13  ;;  %v2382_v13 = vunpack.c.h.bf16 %v2489_v20  ;;  %v2454_v45 = vunpack.c.h.bf16 %v2501_v12 }
 0x224   : > { %v2886_v29 = vpop.eup %2885  ;;  %2905 = vlog2.f32 %v1451_v35  ;;  %v1672_v19 = vmul.f32 %v2884_v23, %v4431_v37  ;;  %v1718_v9 = vmul.f32 %v2413_v57, %v1694_v33  ;;  %v2381_v35 = vunpack.c.l.bf16 %v2489_v20 }
 0x225   : > { %v2888_v43 = vpop.eup %2887  ;;  %v1784_v62 = vmul.f32 %v2886_v29, %v4431_v37  ;;  %v1568_v25 = vsub.f32 %v1559_v58, %v4439_v14  ;;  %2907 = vtanh.f32 %v1793_v10  ;;  %v2453_v29 = vunpack.c.l.bf16 %v2501_v12 }
 0x226   : > { %v1680_v21 = vsub.f32 %v1672_v19, %v4439_v14  ;;  %v2431_v31 = vpack.c.bf16 %v1719_v24, %v1718_v9  ;;  %v1582_v39 = vmax.f32 %v2888_v43, 0.0 }
 0x227   : > { %2909 = vtanh.f32 %v1568_v25  ;;  %v1792_v6 = vsub.f32 %v1784_v62, %v4439_v14  ;;  %v2890_v4 = vpop.eup %2889 }
 0x228   : > { %2911 = vtanh.f32 %v1680_v21  ;;  %2497 = vst [vmem:[%s4585_s18 + $0x8] sm:$0xff] %v2431_v31   ;;  %v1606_v16 = vmul.f32 %v2377_v34, %v1582_v39  ;;  %v1805_v28 = vmax.f32 %v2890_v4, 0.0  ;;  %v2417_v34 = vunpack.c.l.bf16 %v2495_v56 }
 0x229   : > { %2913 = vtanh.f32 %v1792_v6  ;;  %v2892_v27 = vpop.eup %2891 }
 0x22a   : > { %v2395_v8 = vpack.c.bf16 %v1607_v38, %v1606_v16  ;;  %v2894_v59 = vpop.eup %2893  ;;  %v1829_v22 = vmul.f32 %v2446_v51, %v1805_v28  ;;  %v1806_v48 = vmax.f32 %v2892_v27, 0.0 }
 0x22b   : > { %v2896_v53 = vpop.eup %2895 }
 0x22c   : > { %2491 = vst [vmem:[%s4592_s30 + $0x8] sm:$0xff] %v2395_v8   ;;  %v2898_v7 = vpop.eup %2897  ;;  %v1418_v42 = vadd.f32 %v2896_v53, %v2894_v59  ;;  %v2462_v5 = vpack.c.bf16 %v1829_v22, %v1828_v32  ;;  %v1830_v26 = vmul.f32 %v2449_v30, %v1806_v48 }
 0x22e   : > { %v2900_v54 = vpop.eup %2899  ;;  %v1450_v40 = vadd.f32 %v2898_v7, %v1418_v42  ;;  %2463 = vst [vmem:[%s4616_s4] sm:$0xff] %v2462_v5  }
 0x22f   : > { %v2902_v61 = vpop.eup %2901  ;;  %v1697_v1 = vmax.f32 %v2900_v54, 0.0 }
 0x230   : > { %v2904_v17 = vpop.eup %2903  ;;  %2915 = vlog2.f32 %v1450_v40  ;;  %v1585_v24 = vmax.f32 %v2902_v61, 0.0 }
 0x231   : > { %v2906_v57 = vpop.eup %2905  ;;  %v1807_v41 = vmax.f32 %v2904_v17, 0.0  ;;  %v1721_v9 = vmul.f32 %v2418_v36, %v1697_v1 }
 0x232   : > { %v2908_v10 = vpop.eup %2907  ;;  %v1467_v11 = vmul.f32 0.6931472, %v2906_v57  ;;  %v1609_v43 = vmul.f32 %v2382_v13, %v1585_v24 }
 0x233   : > { %v1809_v33 = vmax.f32 %v2908_v10, 0.0  ;;  %v1831_v49 = vmul.f32 %v2450_v46, %v1807_v41 }
 0x234   : > { %v2910_v23 = vpop.eup %2909  ;;  %v1475_v58 = vadd.f32 %v1467_v11, %v4512_v63 }
 0x235   : > { %v2912_v19 = vpop.eup %2911  ;;  %v1584_v55 = vmax.f32 %v2910_v23, 0.0  ;;  %v2467_v62 = vpack.c.bf16 %v1831_v49, %v1830_v26  ;;  %v1833_v6 = vmul.f32 %v2454_v45, %v1809_v33  ;;  %v2490_v33 = vld [vmem:[%s3583_s20 + $0x18] sm:$0xff]   ;;  %s1905_s20 = sshll.u32 %s4592_s30, 4  ;;  %s4674_s20 = int_to_ptr.vmem [resolvable:$true] %s1905_s20 }
 0x236   : > { %v2914_v25 = vpop.eup %2913  ;;  %v1483_v3 = vsub.f32 %v4480_v52, %v1475_v58  ;;  %v1491_v21 = vsub.f32 %v4486_v47, %v1475_v58  ;;  %v1499_v31 = vsub.f32 %v4496_v50, %v1475_v58  ;;  %v1696_v39 = vmax.f32 %v2912_v19, 0.0  ;;  %v2496_v49 = vld [vmem:[%s3593_s9 + $0x18] sm:$0xff]   ;;  %s1921_s9 = sshll.u32 %s4585_s18, 4  ;;  %s3103_s21 = scalar_lea.vmem %s4674_s20, 512  ;;  %s4681_s9 = int_to_ptr.vmem [resolvable:$true] %s1921_s9 }
 0x237   : > { %v1608_v38 = vmul.f32 %v2381_v35, %v1584_v55  ;;  %v1808_v63 = vmax.f32 %v2914_v25, 0.0  ;;  %2503 = vst [vmem:[%s4616_s4 + $0x8] sm:$0xff] %v2467_v62   ;;  %v2502_v58 = vld [vmem:[%s3600_s26 + $0x18] sm:$0xff]   ;;  %v2422_v19 = vunpack.c.h.bf16 %v2496_v49  ;;  %s1937_s26 = sshll.u32 %s4616_s4, 4  ;;  %p3104_p10 = scmp.ne.s32.totalorder %s4674_s20, %s3103_s21  ;;  %s4690_s26 = int_to_ptr.vmem [resolvable:$true] %s1937_s26 }
 0x238   : > { %v1510_v51 = vsel %vm1502_vm0, %v1483_v3, 0.0  ;;  %v1552_v4 = vmul.f32 1.442695, %v1483_v3  ;;  %v1666_v16 = vmul.f32 1.442695, %v1491_v21  ;;  %v1720_v28 = vmul.f32 %v2417_v34, %v1696_v39  ;;  %p3110_p12 = scmp.lt.s32.totalorder %s4674_s20, %s3108_s17  ;;  %p3111_p2 = scmp.lt.s32.totalorder %s3109_s1, %s3103_s21 }
 0x239   : > { %v1519_v52 = vsel %vm1511_vm2, %v1491_v21, %v1510_v51  ;;  %v1778_v47 = vmul.f32 1.442695, %v1499_v31  ;;  %v2400_v50 = vpack.c.bf16 %v1609_v43, %v1608_v38  ;;  %v1832_v2 = vmul.f32 %v2453_v29, %v1808_v63  ;;  %p3105_p1 = pnand %p3104_p10, %p4949_p11 }
 0x23a   : > { %v1528_v32 = vsel %vm1520_vm3, %v1499_v31, %v1519_v52  ;;  %v2436_v27 = vpack.c.bf16 %v1721_v9, %v1720_v28  ;;  %2917 = vpow2.f32 %v1552_v4  ;;  %v2386_v29 = vunpack.c.h.bf16 %v2490_v33  ;;  %p3112_p6 = por %p3111_p2, %p3110_p12 }
 0x23b   : > { %1537 = vst.msk [vmem:[%s4355_s14 + $0x38] sm:$0xff] %vm1529_vm1, %v1528_v32  ;;  %2492 = vst [vmem:[%s4592_s30 + $0x10] sm:$0xff] %v2400_v50   ;;  %v2472_v8 = vpack.c.bf16 %v1833_v6, %v1832_v2  ;;  %2919 = vpow2.f32 %v1666_v16  ;;  %v2385_v9 = vunpack.c.l.bf16 %v2490_v33  ;;  %v2458_v43 = vunpack.c.h.bf16 %v2502_v58  ;;  %p3106_p4 = pneg %p3105_p1 }
 0x23c   : > { %2498 = vst [vmem:[%s4585_s18 + $0x10] sm:$0xff] %v2436_v27   ;;  %2921 = vpow2.f32 %v1778_v47  ;;  %v2457_v31 = vunpack.c.l.bf16 %v2502_v58 }
 0x23d   : > { %2504 = vst [vmem:[%s4616_s4 + $0x10] sm:$0xff] %v2472_v8   ;;  %v2916_v59 = vpop.eup %2915  ;;  %p3113_p3 = pnand %p3112_p6, %p3106_p4 }
 0x23e   : > { %v1465_v22 = vmul.f32 0.6931472, %v2916_v59 }
 0x240   : > { %v1474_v53 = vadd.f32 %v1465_v22, %v4568_v44 }
 0x242   : > { %v1482_v48 = vsub.f32 %v4499_v15, %v1474_v53  ;;  %v1490_v30 = vsub.f32 %v4520_v18, %v1474_v53  ;;  %v1498_v7 = vsub.f32 %v4559_v60, %v1474_v53 }
 0x244   : > { %v1509_v42 = vsel %vm1502_vm0, %v1482_v48, 0.0  ;;  %v1550_v56 = vmul.f32 1.442695, %v1482_v48  ;;  %v1664_v20 = vmul.f32 1.442695, %v1490_v30 }
 0x245   : > { %v1518_v5 = vsel %vm1511_vm2, %v1490_v30, %v1509_v42  ;;  %v1776_v54 = vmul.f32 1.442695, %v1498_v7 }
 0x246   : > { %v1527_v61 = vsel %vm1520_vm3, %v1498_v7, %v1518_v5  ;;  %2923 = vpow2.f32 %v1550_v56 }
 0x247   : > { %v2918_v44 = vpop.eup %2917  ;;  %1536 = vst.msk [vmem:[%s4355_s14 + $0x30] sm:$0xff] %vm1529_vm1, %v1527_v61  ;;  %2925 = vpow2.f32 %v1664_v20 }
 0x248   : > { %v2920_v15 = vpop.eup %2919  ;;  %2927 = vpow2.f32 %v1776_v54  ;;  %v1562_v60 = vmul.f32 %v2918_v44, %v4431_v37 }
 0x249   : > { %v2922_v18 = vpop.eup %2921  ;;  %v1675_v40 = vmul.f32 %v2920_v15, %v4431_v37 }
 0x24a   : > { %v1787_v46 = vmul.f32 %v2922_v18, %v4431_v37  ;;  %v1571_v17 = vsub.f32 %v1562_v60, %v4439_v14 }
 0x24b   : > { %v1683_v36 = vsub.f32 %v1675_v40, %v4439_v14 }
 0x24c   : > { %v1795_v0 = vsub.f32 %v1787_v46, %v4439_v14  ;;  %2929 = vtanh.f32 %v1571_v17 }
 0x24d   : > { %2931 = vtanh.f32 %v1683_v36 }
 0x24e   : > { %2933 = vtanh.f32 %v1795_v0 }
 0x253   : > { %v2924_v13 = vpop.eup %2923 }
 0x254   : > { %v2926_v12 = vpop.eup %2925  ;;  %v1561_v26 = vmul.f32 %v2924_v13, %v4431_v37 }
 0x255   : > { %v2928_v57 = vpop.eup %2927  ;;  %v1674_v1 = vmul.f32 %v2926_v12, %v4431_v37 }
 0x256   : > { %v1786_v24 = vmul.f32 %v2928_v57, %v4431_v37  ;;  %v1570_v41 = vsub.f32 %v1561_v26, %v4439_v14 }
 0x257   : > { %v1682_v10 = vsub.f32 %v1674_v1, %v4439_v14 }
 0x258   : > { %2935 = vtanh.f32 %v1570_v41  ;;  %v1794_v11 = vsub.f32 %v1786_v24, %v4439_v14  ;;  %v2421_v14 = vunpack.c.l.bf16 %v2496_v49 }
 0x259   : > { %2937 = vtanh.f32 %v1682_v10  ;;  %v2930_v35 = vpop.eup %2929 }
 0x25a   : > { %2939 = vtanh.f32 %v1794_v11  ;;  %v2932_v45 = vpop.eup %2931  ;;  %v1587_v34 = vmax.f32 %v2930_v35, 0.0 }
 0x25b   : > { %v2934_v23 = vpop.eup %2933  ;;  %v1699_v37 = vmax.f32 %v2932_v45, 0.0 }
 0x25c   : > { %v1811_v55 = vmax.f32 %v2934_v23, 0.0  ;;  %v1611_v21 = vmul.f32 %v2386_v29, %v1587_v34 }
 0x25d   : > { %v1723_v63 = vmul.f32 %v2422_v19, %v1699_v37 }
 0x25e   : > { %v4666_v4 = vmul.f32 %v2458_v43, %v1811_v55 }
 0x265   : > { %v2936_v62 = vpop.eup %2935 }
 0x266   : > { %v2938_v25 = vpop.eup %2937  ;;  %v1586_v3 = vmax.f32 %v2936_v62, 0.0 }
 0x267   : > { %v2940_v39 = vpop.eup %2939  ;;  %v1698_v38 = vmax.f32 %v2938_v25, 0.0 }
 0x268   : > { %v1610_v6 = vmul.f32 %v2385_v9, %v1586_v3  ;;  %v1810_v51 = vmax.f32 %v2940_v39, 0.0 }
 0x269   : > { %v1722_v16 = vmul.f32 %v2421_v14, %v1698_v38 }
 0x26a   : > { %v2405_v28 = vpack.c.bf16 %v1611_v21, %v1610_v6  ;;  %v1834_v52 = vmul.f32 %v2457_v31, %v1810_v51 }
 0x26b   : > { %v2441_v47 = vpack.c.bf16 %v1723_v63, %v1722_v16 }
 0x26c   : > { %2493 = vst [vmem:[%s4592_s30 + $0x18] sm:$0xff] %v2405_v28   ;;  %v2477_v50 = vpack.c.bf16 %v4666_v4, %v1834_v52 }
 0x26d   : > { %2499 = vst [vmem:[%s4585_s18 + $0x18] sm:$0xff] %v2441_v47  }
 0x26e   : > { %3116 = shalt.err (!%p3113_p3)
}
 0x26f   : > { %s3117_s18 = scalar_lea.hbm %s4672_s19, 512  ;;  %s3121_s14 = scalar_lea.hbm %s4946_s25, 2048 }
 0x270   : > { %p3118_p5 = scmp.ne.s32.totalorder %s4672_s19, %s3117_s18  ;;  %p3122_p9 = scmp.lt.s32.totalorder %s4672_s19, %s4946_s25 }
 0x271   : > { %p3123_p13 = scmp.lt.s32.totalorder %s3121_s14, %s3117_s18 }
 0x272   : > { %p3119_p0 = pnand %p3118_p5, %p4949_p11 }
 0x273   : > { %p3124_p8 = por %p3123_p13, %p3122_p9 }
 0x274   : > { %p3120_p7 = pneg %p3119_p0 }
 0x276   : > { %p3125_p10 = pnand %p3124_p8, %p3120_p7 }
 0x278   : > { %3128 = shalt.err (!%p3125_p10)
}
 0x279   : > { %s3257_s1 = smov 64   ;;  %s3258_s21 = smov 4  }
 0x27a   : > { %2536 = dma.vmem_to_hbm [thread:$0]  (%p4949_p11), %s4674_s20, 512, %s4672_s19, %s1877_s15, %s3257_s1, %s3257_s1, %s3258_s21  }
 0x27b   : > { %s4950_s17 = sand.u32 1, %s3350_s28   ;;  %s3129_s30 = scalar_lea.vmem %s4681_s9, 512 }
 0x27c   : > { %s4721_s18 = scalar_lea.sflag [#allocation20], %s4950_s17  ;;  %p3130_p1 = scmp.ne.s32.totalorder %s4681_s9, %s3129_s30 }
 0x27d   : > { %s3259_s11 = smov [#allocation19]  }
 0x27e   : > { %p3131_p4 = pnand %p3130_p1, %p4949_p11  ;;  %s3133_s14 = sshll.u32 %s3259_s11, 4  ;;  %s3134_s14 = int_to_ptr.vmem [resolvable:$false] %s3133_s14 }
 0x27f   : > { %s3135_s2 = scalar_lea.vmem %s3134_s14, 1024  ;;  %p3136_p2 = scmp.lt.s32.totalorder %s4681_s9, %s3134_s14 }
 0x280   : > { %p3132_p12 = pneg %p3131_p4  ;;  %p3137_p6 = scmp.lt.s32.totalorder %s3135_s2, %s3129_s30 }
 0x282   : > { %p3138_p3 = por %p3137_p6, %p3136_p2 }
 0x284   : > { %p3139_p5 = pnand %p3138_p3, %p3132_p12 }
 0x286   : > { %3142 = shalt.err (!%p3139_p5)
}
 0x287   : > { %s3143_s28 = scalar_lea.hbm %s4679_s24, 512  ;;  %s3147_s19 = scalar_lea.hbm %s4947_s13, 2048 }
 0x288   : > { %p3144_p0 = scmp.ne.s32.totalorder %s4679_s24, %s3143_s28  ;;  %p3148_p13 = scmp.lt.s32.totalorder %s4679_s24, %s4947_s13 }
 0x289   : > { %p3149_p8 = scmp.lt.s32.totalorder %s3147_s19, %s3143_s28 }
 0x28a   : > { %p3145_p7 = pnand %p3144_p0, %p4949_p11 }
 0x28b   : > { %p3150_p10 = por %p3149_p8, %p3148_p13 }
 0x28c   : > { %p3146_p9 = pneg %p3145_p7 }
 0x28e   : > { %p3151_p1 = pnand %p3150_p10, %p3146_p9 }
 0x290   : > { %3154 = shalt.err (!%p3151_p1)
}
 0x291   : > { %2537 = dma.vmem_to_hbm [thread:$0]  (%p4949_p11), %s4681_s9, 512, %s4679_s24, %s4721_s18, %s3257_s1, %s3257_s1, %s3258_s21  }
 0x292   : > { %2505 = vst [vmem:[%s4616_s4 + $0x18] sm:$0xff] %v2477_v50   ;;  %s3155_s17 = scalar_lea.vmem %s4690_s26, 512  ;;  %s3260_s30 = smov [#allocation21]  }
 0x293   : > { %p3156_p4 = scmp.ne.s32.totalorder %s4690_s26, %s3155_s17  ;;  %s3159_s11 = sshll.u32 %s3260_s30, 4  ;;  %s3160_s11 = int_to_ptr.vmem [resolvable:$false] %s3159_s11 }
 0x294   : > { %s3161_s14 = scalar_lea.vmem %s3160_s11, 1024  ;;  %p3162_p6 = scmp.lt.s32.totalorder %s4690_s26, %s3160_s11 }
 0x295   : > { %p3157_p12 = pnand %p3156_p4, %p4949_p11  ;;  %p3163_p3 = scmp.lt.s32.totalorder %s3161_s14, %s3155_s17 }
 0x297   : > { %p3158_p2 = pneg %p3157_p12  ;;  %p3164_p5 = por %p3163_p3, %p3162_p6 }
 0x299   : > { %p3165_p0 = pnand %p3164_p5, %p3158_p2 }
 0x29b   : > { %3168 = shalt.err (!%p3165_p0)
}
 0x29c   : > { %s3169_s9 = scalar_lea.hbm %s4686_s29, 512  ;;  %s3173_s2 = scalar_lea.hbm %s4948_s27, 2048 }
 0x29d   : > { %p3170_p7 = scmp.ne.s32.totalorder %s4686_s29, %s3169_s9  ;;  %p3174_p8 = scmp.lt.s32.totalorder %s4686_s29, %s4948_s27 }
 0x29e   : > { %p3175_p10 = scmp.lt.s32.totalorder %s3173_s2, %s3169_s9 }
 0x29f   : > { %p3171_p9 = pnand %p3170_p7, %p4949_p11 }
 0x2a0   : > { %p3176_p1 = por %p3175_p10, %p3174_p8 }
 0x2a1   : > { %p3172_p13 = pneg %p3171_p9 }
 0x2a3   : > { %p3177_p4 = pnand %p3176_p1, %p3172_p13 }
 0x2a5   : > { %3180 = shalt.err (!%p3177_p4)
}
 0x2a6   : > { %2538 = dma.vmem_to_hbm [thread:$0]  (%p4949_p11), %s4690_s26, 512, %s4686_s29, %s4721_s18, %s3257_s1, %s3257_s1, %s3258_s21  }
 0x2a7 PF: > { %s4951_s20 = sld [smem:[#allocation31_spill]] }
 0x2a8   : > { %s4952_s19 = sld [smem:[#allocation30_spill]] }
 0x2a9   : > { %s4953_s15 = sld [smem:[#allocation34_spill]] }
 0x2ad   : > { %p2594_p12 = scmp.ge.s32.totalorder %s4951_s20, 2 }
 0x2ae   : > { %s1956_s10 = sand.u32 1, %s4952_s19  }
 0x2af   : > { %p4954_p2 = scmp.ne.s32.totalorder %s4953_s15, 0  ;;  %s1957_s17 = scalar_lea.sflag [#allocation4], %s1956_s10 }
 0x2b1   : > { %p2572_p6 = pnand %p2594_p12, %p4954_p2 }
 0x2b3   : > { %p2573_p3 = pneg %p2572_p6 }
 0x2b5   : > { %3222 = dma.done.wait (%p2573_p3), %s1957_s17, 512  }
 0x2b6   : > { %3224 = vsyncadd (%p2573_p3), %s1957_s17, 4294966784  ;;  %s4955_s16 = sadd.s32 4294967294, %s4951_s20  }
 0x2b7   : > { %s1965_s30 = sand.u32 1, %s4955_s16  }
 0x2b8   : > { %s1966_s11 = scalar_lea.sflag [#allocation20], %s1965_s30 }
 0x2b9   : > { %3226 = dma.done.wait (%p2573_p3), %s1966_s11, 1024  }
 0x2ba   : > { %3228 = vsyncadd (%p2573_p3), %s1966_s11, 4294966272  ;;  %s4956_s24 = sld [smem:[#allocation32_spill]]  ;;  %s4958_s21 = smov %s3235_s22 }
 0x2bb   : > { %s4957_s26 = sld [smem:[#allocation33_spill]]  ;;  %s4959_s22 = smov %s3239_s23 }
 0x2c0   : > { %p36_p11 = scmp.ge.s32.totalorder %s4956_s24, 6  }
 0x2c1   : > { %s4960_s23 = smov %s4957_s26 }
 0x2c2   :  { %38 = sbr.rel (!%p36_p11) target bundleno = 21 (0x15), region = 195 }
 0x2c7   :  { %1988 = vsyncpa [#allocation3], 1 }
 0x2c8   :  { %1990 = vsyncpa [#allocation3 + $0x1], 1 }
 0x2c9   :  { %1991 = vsyncpa [#allocation16], 1 }
 0x2ca   :  { %1993 = vsyncpa [#allocation16 + $0x1], 1 }
 0x2cb   :  { %1994 = vsyncpa [#allocation4], 1 }
 0x2cc   :  { %1996 = vsyncpa [#allocation4 + $0x1], 1 }
 0x2cd   :  { %1997 = vsyncpa [#allocation20], 1 }
 0x2ce   :  { %1999 = vsyncpa [#allocation20 + $0x1], 1 }
 0x2cf   :  { %2000 = vsyncpa [#allocation5], 1 }
 0x2d0   :  { %2002 = vsyncpa [#allocation5 + $0x1], 1 }
 0x2d1   :  { %2003 = vsyncpa [#allocation9], 1 }
 0x2d2   :  { %2004 = vsyncpa [#allocation6], 1 }
 0x2d3   :  { %2006 = vsyncpa [#allocation6 + $0x1], 1 }
 0x2d4   :  { %2007 = vsyncpa [#allocation12], 1 }

</bundles_post_ra>
